<compile_context>
chip_gen: v6e
topology: v6e:2x2x1
jax: 0.10.0
libtpu: 0.0.40
codegen_flags: <defaults>
</compile_context>

<pallas_src>
import jax
import jax.numpy as jnp
import numpy as np
from functools import partial
from jax import lax
from jax.experimental import pallas as pl
from jax.experimental.pallas import tpu as pltpu

# ----- model dims (small, consistent with the module's forward) -----
OBS_DIM = 16
LANE_DIM = 16
DS_HIDDEN = 16                               # driving_style_hidden_size (E)
INPUT_SIZE = OBS_DIM + LANE_DIM + DS_HIDDEN  # 48
HIDDEN = 32
NUM_LAYERS = 2
N_PREDICT = 4
OUT_LENGTH = 8
BS = 2

VMEM_SPEC = pl.BlockSpec(memory_space=pltpu.MemorySpace.VMEM)


# ---------------------------------------------------------------------------
# Fused kernel: attention over modes -> 2-layer LSTM decode (unrolled) ->
# fused traj head -> trajprob head (+ per-batch softmax).
# ---------------------------------------------------------------------------
def decoder_kernel(obs_ref, lane_ref, ds_ref,
                   wq_ref, wk_ref, wv_ref, bq_ref, bk_ref, bv_ref, wo_ref, bo_ref,
                   lstm_w_ref, lstm_b0_ref, lstm_b1_ref,
                   traj_w_ref, traj_b_ref,
                   prob_w1_ref, prob_b1_ref, prob_w2_ref, prob_b2_ref,
                   traj_ref, prob_ref):
    f32 = jnp.float32
    H = HIDDEN
    P = N_PREDICT
    bs = obs_ref.shape[0]
    M = bs * P

    def mm(a, b):                      # default MXU precision
        return jnp.dot(a, b, preferred_element_type=f32)

    # ---- mode2mode single-head attention over the P modes + residual + 2-D LN ----
    x = ds_ref[...]                                              # (P, E)
    q = mm(x, wq_ref[...]) + bq_ref[...]
    k = mm(x, wk_ref[...]) + bk_ref[...]
    v = mm(x, wv_ref[...]) + bv_ref[...]
    s = mm(q, k.T) * (1.0 / np.sqrt(DS_HIDDEN))
    s = s - jnp.max(s, axis=-1, keepdims=True)
    es = jnp.exp(s)
    att = mm(es / jnp.sum(es, axis=-1, keepdims=True), v)
    y = x + mm(att, wo_ref[...]) + bo_ref[...]
    mu = jnp.mean(y)                                             # layer_norm over (P, E)
    var = jnp.mean((y - mu) ** 2)
    ds_n = (y - mu) / jnp.sqrt(var + 1e-5)                       # (P, E)

    # ---- exact 0/1 selection matrices (row m of the decoder = batch m//P, mode m%P);
    #      they replace the broadcast/concat/reshape glue of the PyTorch forward ----
    def iota2(shape, dim):
        return lax.broadcasted_iota(jnp.int32, shape, dim)

    mi, bi = iota2((M, bs), 0), iota2((M, bs), 1)
    sel_b = ((mi >= bi * P) & (mi < bi * P + P)).astype(f32)     # (M, bs): b == m//P
    bi2, mi2 = iota2((bs, M), 0), iota2((bs, M), 1)
    sel_bt = ((mi2 >= bi2 * P) & (mi2 < bi2 * P + P)).astype(f32)  # (bs, M) transpose
    mi3, pi3 = iota2((M, P), 0), iota2((M, P), 1)
    hit = mi3 == pi3
    for b in range(1, bs):
        hit = hit | (mi3 == pi3 + b * P)
    sel_p = hit.astype(f32)                                      # (M, P): p == m%P

    # ---- LSTM weight blocks (packed once in prepare_params) ----
    w0_obs = lstm_w_ref[0:OBS_DIM, :]
    w0_lane = lstm_w_ref[OBS_DIM:OBS_DIM + LANE_DIM, :]
    w0_ds = lstm_w_ref[OBS_DIM + LANE_DIM:INPUT_SIZE, :]
    whh0 = lstm_w_ref[INPUT_SIZE:INPUT_SIZE + H, :]
    wih1 = lstm_w_ref[INPUT_SIZE + H:INPUT_SIZE + 2 * H, :]
    whh1 = lstm_w_ref[INPUT_SIZE + 2 * H:INPUT_SIZE + 3 * H, :]
    b1 = lstm_b1_ref[...]

    # Layer-0 input->gate term: compute at bs / P rows first, then expand to M rows.
    xg0_b = mm(obs_ref[...], w0_obs) + mm(lane_ref[...], w0_lane)   # (bs, 4H)
    xg0_p = mm(ds_n, w0_ds)                                         # (P, 4H)
    xg0 = mm(sel_b, xg0_b) + mm(sel_p, xg0_p) + lstm_b0_ref[...]    # (M, 4H), time-invariant

    def gates(pre, c_prev):            # PyTorch gate order: i, f, g, o
        i = jax.nn.sigmoid(pre[:, 0 * H:1 * H])
        f = jax.nn.sigmoid(pre[:, 1 * H:2 * H])
        g = jnp.tanh(pre[:, 2 * H:3 * H])
        o = jax.nn.sigmoid(pre[:, 3 * H:4 * H])
        c = f * c_prev + i * g
        return o * jnp.tanh(c), c

    zero = jnp.zeros((M, H), f32)
    # t = 0: all hidden / cell states are zero -> skip the zero h-recurrence matmuls.
    h0, c0 = gates(xg0, zero)
    h1, c1 = gates(mm(h0, wih1) + b1, zero)
    hs = [h1]
    for _ in range(1, OUT_LENGTH):     # static unroll; state stays in vregs
        h0, c0 = gates(xg0 + mm(h0, whh0), c0)
        h1, c1 = gates(mm(h0, wih1) + mm(h1, whh1) + b1, c1)
        hs.append(h1)
    h1cat = jnp.concatenate(hs, axis=-1)                            # (M, T*H) in vregs

    # ---- traj head: ONE (M, T*H) @ block_diag(Wt,...,Wt) matmul, ONE dense store ----
    traj_ref[...] = mm(h1cat, traj_w_ref[...]) + traj_b_ref[...]    # (M, T*2)

    # ---- trajprob head: Linear -> LeakyReLU(0.01) -> Linear -> softmax over modes ----
    hp_b = (mm(obs_ref[...], prob_w1_ref[0:OBS_DIM, :])
            + mm(lane_ref[...], prob_w1_ref[OBS_DIM:OBS_DIM + LANE_DIM, :]))  # (bs, H)
    hp_p = mm(ds_n, prob_w1_ref[OBS_DIM + LANE_DIM:INPUT_SIZE, :])            # (P, H)
    hp = mm(sel_b, hp_b) + mm(sel_p, hp_p) + prob_b1_ref[...]                 # (M, H)
    hp = jnp.where(hp > 0, hp, 0.01 * hp)
    logits = mm(hp, prob_w2_ref[...]) + prob_b2_ref[...]                      # (M, 1)
    e = jnp.exp(logits - jnp.max(logits))      # global shift: per-batch softmax invariant
    seg_sum = mm(sel_b, mm(sel_bt, e))         # per-batch sum of exps, broadcast back
    prob_ref[...] = e / seg_sum


# ---------------------------------------------------------------------------
# Jitted forward (single kernel launch + two reshapes + one slice).
# ---------------------------------------------------------------------------
@partial(jax.jit, static_argnames=("out_length",))
def trajectory_decoder_forward(kparams, obs_feature, lane_change_feature,
                               out_length=OUT_LENGTH):
    assert out_length == OUT_LENGTH
    bs = obs_feature.shape[0]
    M = bs * N_PREDICT
    traj_flat, prob_flat = pl.pallas_call(
        decoder_kernel,
        out_shape=(jax.ShapeDtypeStruct((M, OUT_LENGTH * 2), jnp.float32),
                   jax.ShapeDtypeStruct((M, 1), jnp.float32)),
        in_specs=[VMEM_SPEC] * 20,
        out_specs=(VMEM_SPEC, VMEM_SPEC),
    )(obs_feature, lane_change_feature, kparams["ds"],
      kparams["wq"], kparams["wk"], kparams["wv"],
      kparams["bq"], kparams["bk"], kparams["bv"],
      kparams["wo"], kparams["bo"],
      kparams["lstm_w"], kparams["lstm_b0"], kparams["lstm_b1"],
      kparams["traj_w"], kparams["traj_b"],
      kparams["prob_w1"], kparams["prob_b1"], kparams["prob_w2"], kparams["prob_b2"])
    traj = traj_flat.reshape(bs, N_PREDICT, OUT_LENGTH, 2)
    prob = prob_flat.reshape(bs, N_PREDICT)
    return traj, prob, traj[:, :, -1, :]


# ---------------------------------------------------------------------------
# Parameters (deterministic, PyTorch-like init shapes)
# ---------------------------------------------------------------------------
def init_params(key):
    ks = jax.random.split(key, 20)

    def u(k, shape, scale):
        return jax.random.uniform(k, shape, jnp.float32, -scale, scale)

    sH = 1.0 / np.sqrt(HIDDEN)
    sE = 1.0 / np.sqrt(DS_HIDDEN)
    sI = 1.0 / np.sqrt(INPUT_SIZE)
    p = {}
    p["driving_style"] = jax.random.normal(ks[0], (N_PREDICT, DS_HIDDEN), jnp.float32)
    # LSTM (num_layers=2), PyTorch gate order i,f,g,o; weights (4H, in)
    p["wih0"] = u(ks[1], (4 * HIDDEN, INPUT_SIZE), sH)
    p["whh0"] = u(ks[2], (4 * HIDDEN, HIDDEN), sH)
    p["bih0"] = u(ks[3], (4 * HIDDEN,), sH)
    p["bhh0"] = u(ks[4], (4 * HIDDEN,), sH)
    p["wih1"] = u(ks[5], (4 * HIDDEN, HIDDEN), sH)
    p["whh1"] = u(ks[6], (4 * HIDDEN, HIDDEN), sH)
    p["bih1"] = u(ks[7], (4 * HIDDEN,), sH)
    p["bhh1"] = u(ks[8], (4 * HIDDEN,), sH)
    # traj_head: Linear(hidden, 2)
    p["wt"] = u(ks[9], (2, HIDDEN), sH)
    p["bt"] = u(ks[10], (2,), sH)
    # trajprob_head: Linear(input_size, hidden) -> Linear(hidden, 1)
    p["wp1"] = u(ks[11], (HIDDEN, INPUT_SIZE), sI)
    p["bp1"] = u(ks[12], (HIDDEN,), sI)
    p["wp2"] = u(ks[13], (1, HIDDEN), sH)
    p["bp2"] = u(ks[14], (1,), sH)
    # mode2mode attention (num_heads=1): in_proj (3E, E), out_proj (E, E)
    p["w_in"] = u(ks[15], (3 * DS_HIDDEN, DS_HIDDEN), sE)
    p["b_in"] = jnp.zeros((3 * DS_HIDDEN,), jnp.float32)
    p["wo"] = u(ks[16], (DS_HIDDEN, DS_HIDDEN), sE)
    p["bo"] = jnp.zeros((DS_HIDDEN,), jnp.float32)
    return p


def prepare_params(p):
    """One-time repack of the PyTorch-layout params into kernel-ready arrays."""
    E, H, T = DS_HIDDEN, HIDDEN, OUT_LENGTH
    w_in = np.asarray(p["w_in"], np.float32)
    b_in = np.asarray(p["b_in"], np.float32)
    kp = {}
    kp["ds"] = jnp.asarray(p["driving_style"], jnp.float32)
    kp["wq"] = jnp.asarray(w_in[0:E].T)
    kp["wk"] = jnp.asarray(w_in[E:2 * E].T)
    kp["wv"] = jnp.asarray(w_in[2 * E:].T)
    kp["bq"] = jnp.asarray(b_in[0:E][None])
    kp["bk"] = jnp.asarray(b_in[E:2 * E][None])
    kp["bv"] = jnp.asarray(b_in[2 * E:][None])
    kp["wo"] = jnp.asarray(np.asarray(p["wo"], np.float32).T)
    kp["bo"] = jnp.asarray(np.asarray(p["bo"], np.float32)[None])
    # LSTM: pack the transposed weight blocks into one (144, 4H) matrix:
    # rows [0:16]=obs, [16:32]=lane, [32:48]=ds (wih0.T), [48:80]=whh0.T,
    # [80:112]=wih1.T, [112:144]=whh1.T.
    lstm_w = np.concatenate([np.asarray(p["wih0"], np.float32).T,
                             np.asarray(p["whh0"], np.float32).T,
                             np.asarray(p["wih1"], np.float32).T,
                             np.asarray(p["whh1"], np.float32).T], axis=0)
    kp["lstm_w"] = jnp.asarray(lstm_w)
    kp["lstm_b0"] = jnp.asarray(
        (np.asarray(p["bih0"], np.float32) + np.asarray(p["bhh0"], np.float32))[None])
    kp["lstm_b1"] = jnp.asarray(
        (np.asarray(p["bih1"], np.float32) + np.asarray(p["bhh1"], np.float32))[None])
    # traj head folded into ONE block-diagonal matmul over the stacked hidden states.
    wt_t = np.asarray(p["wt"], np.float32).T            # (H, 2)
    traj_w = np.zeros((T * H, T * 2), np.float32)
    for t in range(T):
        traj_w[t * H:(t + 1) * H, t * 2:(t + 1) * 2] = wt_t
    kp["traj_w"] = jnp.asarray(traj_w)
    kp["traj_b"] = jnp.asarray(np.tile(np.asarray(p["bt"], np.float32), T)[None])
    kp["prob_w1"] = jnp.asarray(np.asarray(p["wp1"], np.float32).T)   # (48, 32)
    kp["prob_b1"] = jnp.asarray(np.asarray(p["bp1"], np.float32)[None])
    kp["prob_w2"] = jnp.asarray(np.asarray(p["wp2"], np.float32).T)   # (32, 1)
    kp["prob_b2"] = jnp.asarray(np.asarray(p["bp2"], np.float32)[None])
    return kp


# ---------------------------------------------------------------------------
# Pure-JAX reference (mirrors the PyTorch forward) for correctness checking.
# ---------------------------------------------------------------------------
# TODO(synk): driving_style_generator branches (use_traj_prior / use_endpoint_prior)
#             are not exercised here (forward called with driving_style_prior=None).
def reference_forward(params, obs_feature, lane_change_feature, out_length=OUT_LENGTH):
    p = params
    bs = obs_feature.shape[0]
    E = DS_HIDDEN
    H = HIDDEN

    ds = jnp.broadcast_to(p["driving_style"][None], (bs, N_PREDICT, E))
    wq, wk, wv = p["w_in"][:E], p["w_in"][E:2 * E], p["w_in"][2 * E:]
    bq, bk, bv = p["b_in"][:E], p["b_in"][E:2 * E], p["b_in"][2 * E:]
    q = ds @ wq.T + bq
    k = ds @ wk.T + bk
    v = ds @ wv.T + bv
    s = jnp.einsum('bqe,bke->bqk', q, k) / jnp.sqrt(jnp.float32(E))
    a = jax.nn.softmax(s, axis=-1)
    att = jnp.einsum('bqk,bke->bqe', a, v) @ p["wo"].T + p["bo"]
    y = ds + att
    mu = y.mean(axis=(-2, -1), keepdims=True)
    var = ((y - mu) ** 2).mean(axis=(-2, -1), keepdims=True)
    ds_norm = (y - mu) / jnp.sqrt(var + 1e-5)

    obs_e = jnp.broadcast_to(obs_feature[:, None, :], (bs, N_PREDICT, OBS_DIM))
    lane_e = jnp.broadcast_to(lane_change_feature[:, None, :], (bs, N_PREDICT, LANE_DIM))
    input_ = jnp.concatenate([obs_e, lane_e, ds_norm], axis=-1)

    x = input_.reshape(bs * N_PREDICT, INPUT_SIZE)
    M = x.shape[0]
    seq = jnp.broadcast_to(x[None], (out_length, M, INPUT_SIZE))      # time-major

    def lstm_layer(seq_in, wih, whh, bih, bhh):
        def step(carry, xt):
            h, c = carry
            pre = xt @ wih.T + bih + h @ whh.T + bhh
            i = jax.nn.sigmoid(pre[:, :H])
            f = jax.nn.sigmoid(pre[:, H:2 * H])
            g = jnp.tanh(pre[:, 2 * H:3 * H])
            o = jax.nn.sigmoid(pre[:, 3 * H:])
            c = f * c + i * g
            h = o * jnp.tanh(c)
            return (h, c), h
        init = (jnp.zeros((M, H), jnp.float32), jnp.zeros((M, H), jnp.float32))
        _, hs = lax.scan(step, init, seq_in)
        return hs

    h1 = lstm_layer(seq, p["wih0"], p["whh0"], p["bih0"], p["bhh0"])
    h2 = lstm_layer(h1, p["wih1"], p["whh1"], p["bih1"], p["bhh1"])
    traj = h2 @ p["wt"].T + p["bt"]                                   # (T, M, 2)
    traj = jnp.transpose(traj, (1, 0, 2)).reshape(bs, N_PREDICT, out_length, 2)

    hp = input_ @ p["wp1"].T + p["bp1"]
    hp = jnp.where(hp > 0, hp, 0.01 * hp)
    logits = (hp @ p["wp2"].T + p["bp2"])[..., 0]
    probs = jax.nn.softmax(logits, axis=-1)
    return traj, probs, traj[:, :, -1, :]


if __name__ == "__main__":
    key = jax.random.PRNGKey(0)
    k_param, k_obs, k_lane = jax.random.split(key, 3)
    params = init_params(k_param)
    kparams = prepare_params(params)      # one-time weight repack (outside the hot path)
    obs = jax.random.normal(k_obs, (BS, OBS_DIM), jnp.float32)
    lane = jax.random.normal(k_lane, (BS, LANE_DIM), jnp.float32)

    traj, prob, endpoint = trajectory_decoder_forward(kparams, obs, lane)
    jax.block_until_ready((traj, prob, endpoint))

    # Reference at highest matmul precision; the kernel runs at default MXU precision
    # (bf16 passes), so the comparison tolerance is set accordingly.
    with jax.default_matmul_precision("highest"):
        rtraj, rprob, rend = reference_forward(params, obs, lane, OUT_LENGTH)

    np.testing.assert_allclose(np.asarray(traj), np.asarray(rtraj), rtol=3e-2, atol=3e-2)
    np.testing.assert_allclose(np.asarray(prob), np.asarray(rprob), rtol=3e-2, atol=3e-2)
    np.testing.assert_allclose(np.asarray(endpoint), np.asarray(rend), rtol=3e-2, atol=3e-2)

    assert traj.shape == (BS, N_PREDICT, OUT_LENGTH, 2)
    assert prob.shape == (BS, N_PREDICT)
    assert endpoint.shape == (BS, N_PREDICT, 2)
    print("KERNEL_OK")
</pallas_src>

<mosaic_0001>
module attributes {stable_mosaic.version = 11 : i64} {
  func.func @decoder_kernel(%arg0: memref<2x16xf32, #tpu.memory_space<vmem>>, %arg1: memref<2x16xf32, #tpu.memory_space<vmem>>, %arg2: memref<4x16xf32, #tpu.memory_space<vmem>>, %arg3: memref<16x16xf32, #tpu.memory_space<vmem>>, %arg4: memref<16x16xf32, #tpu.memory_space<vmem>>, %arg5: memref<16x16xf32, #tpu.memory_space<vmem>>, %arg6: memref<1x16xf32, #tpu.memory_space<vmem>>, %arg7: memref<1x16xf32, #tpu.memory_space<vmem>>, %arg8: memref<1x16xf32, #tpu.memory_space<vmem>>, %arg9: memref<16x16xf32, #tpu.memory_space<vmem>>, %arg10: memref<1x16xf32, #tpu.memory_space<vmem>>, %arg11: memref<144x128xf32, #tpu.memory_space<vmem>>, %arg12: memref<1x128xf32, #tpu.memory_space<vmem>>, %arg13: memref<1x128xf32, #tpu.memory_space<vmem>>, %arg14: memref<256x16xf32, #tpu.memory_space<vmem>>, %arg15: memref<1x16xf32, #tpu.memory_space<vmem>>, %arg16: memref<48x32xf32, #tpu.memory_space<vmem>>, %arg17: memref<1x32xf32, #tpu.memory_space<vmem>>, %arg18: memref<32x1xf32, #tpu.memory_space<vmem>>, %arg19: memref<1x1xf32, #tpu.memory_space<vmem>>, %arg20: memref<8x16xf32, #tpu.memory_space<vmem>>, %arg21: memref<8x1xf32, #tpu.memory_space<vmem>>) attributes {dimension_semantics = [], scalar_prefetch = 0 : i64, scratch_operands = 0 : i64, tpu.core_type = #tpu.core_type<tc>} {
    %c0 = arith.constant 0 : index
    %c0_0 = arith.constant 0 : index
    %0 = vector.load %arg2[%c0, %c0_0] : memref<4x16xf32, #tpu.memory_space<vmem>>, vector<4x16xf32>
    %c0_1 = arith.constant 0 : index
    %c0_2 = arith.constant 0 : index
    %1 = vector.load %arg3[%c0_1, %c0_2] : memref<16x16xf32, #tpu.memory_space<vmem>>, vector<16x16xf32>
    %cst = arith.constant dense<0.000000e+00> : vector<4x16xf32>
    %2 = tpu.matmul %0, %1, %cst {dimension_numbers = #tpu.dot_dimension_numbers<[1], [0], [0], [1], [0, 0, 1, 1], [], []>} : vector<4x16xf32>, vector<16x16xf32>, vector<4x16xf32> -> vector<4x16xf32>
    %c0_3 = arith.constant 0 : index
    %c0_4 = arith.constant 0 : index
    %3 = vector.load %arg6[%c0_3, %c0_4] : memref<1x16xf32, #tpu.memory_space<vmem>>, vector<1x16xf32>
    %4 = vector.broadcast %3 : vector<1x16xf32> to vector<4x16xf32>
    %5 = arith.addf %2, %4 : vector<4x16xf32>
    %c0_5 = arith.constant 0 : index
    %c0_6 = arith.constant 0 : index
    %6 = vector.load %arg4[%c0_5, %c0_6] : memref<16x16xf32, #tpu.memory_space<vmem>>, vector<16x16xf32>
    %cst_7 = arith.constant dense<0.000000e+00> : vector<4x16xf32>
    %7 = tpu.matmul %0, %6, %cst_7 {dimension_numbers = #tpu.dot_dimension_numbers<[1], [0], [0], [1], [0, 0, 1, 1], [], []>} : vector<4x16xf32>, vector<16x16xf32>, vector<4x16xf32> -> vector<4x16xf32>
    %c0_8 = arith.constant 0 : index
    %c0_9 = arith.constant 0 : index
    %8 = vector.load %arg7[%c0_8, %c0_9] : memref<1x16xf32, #tpu.memory_space<vmem>>, vector<1x16xf32>
    %9 = vector.broadcast %8 : vector<1x16xf32> to vector<4x16xf32>
    %10 = arith.addf %7, %9 : vector<4x16xf32>
    %c0_10 = arith.constant 0 : index
    %c0_11 = arith.constant 0 : index
    %11 = vector.load %arg5[%c0_10, %c0_11] : memref<16x16xf32, #tpu.memory_space<vmem>>, vector<16x16xf32>
    %cst_12 = arith.constant dense<0.000000e+00> : vector<4x16xf32>
    %12 = tpu.matmul %0, %11, %cst_12 {dimension_numbers = #tpu.dot_dimension_numbers<[1], [0], [0], [1], [0, 0, 1, 1], [], []>} : vector<4x16xf32>, vector<16x16xf32>, vector<4x16xf32> -> vector<4x16xf32>
    %c0_13 = arith.constant 0 : index
    %c0_14 = arith.constant 0 : index
    %13 = vector.load %arg8[%c0_13, %c0_14] : memref<1x16xf32, #tpu.memory_space<vmem>>, vector<1x16xf32>
    %14 = vector.broadcast %13 : vector<1x16xf32> to vector<4x16xf32>
    %15 = arith.addf %12, %14 : vector<4x16xf32>
    %16 = tpu.transpose %10, [1, 0] : vector<4x16xf32> -> vector<16x4xf32>
    %cst_15 = arith.constant dense<0.000000e+00> : vector<4x4xf32>
    %17 = tpu.matmul %5, %16, %cst_15 {dimension_numbers = #tpu.dot_dimension_numbers<[1], [0], [0], [1], [0, 0, 1, 1], [], []>} : vector<4x16xf32>, vector<16x4xf32>, vector<4x4xf32> -> vector<4x4xf32>
    %cst_16 = arith.constant 2.500000e-01 : f32
    %18 = vector.broadcast %cst_16 : f32 to vector<4x4xf32>
    %19 = arith.mulf %17, %18 : vector<4x4xf32>
    %cst_17 = arith.constant dense<0xFF800000> : vector<4xf32>
    %20 = vector.multi_reduction <maximumf>, %19, %cst_17 [1] : vector<4x4xf32> to vector<4xf32>
    %21 = vector.shape_cast %20 : vector<4xf32> to vector<4x1xf32>
    %22 = vector.broadcast %21 : vector<4x1xf32> to vector<4x4xf32>
    %23 = arith.subf %19, %22 : vector<4x4xf32>
    %24 = math.exp %23 : vector<4x4xf32>
    %cst_18 = arith.constant dense<0.000000e+00> : vector<4xf32>
    %25 = vector.multi_reduction <add>, %24, %cst_18 [1] : vector<4x4xf32> to vector<4xf32>
    %26 = vector.shape_cast %25 : vector<4xf32> to vector<4x1xf32>
    %27 = vector.broadcast %26 : vector<4x1xf32> to vector<4x4xf32>
    %28 = arith.divf %24, %27 : vector<4x4xf32>
    %cst_19 = arith.constant dense<0.000000e+00> : vector<4x16xf32>
    %29 = tpu.matmul %28, %15, %cst_19 {dimension_numbers = #tpu.dot_dimension_numbers<[1], [0], [0], [1], [0, 0, 1, 1], [], []>} : vector<4x4xf32>, vector<4x16xf32>, vector<4x16xf32> -> vector<4x16xf32>
    %c0_20 = arith.constant 0 : index
    %c0_21 = arith.constant 0 : index
    %30 = vector.load %arg9[%c0_20, %c0_21] : memref<16x16xf32, #tpu.memory_space<vmem>>, vector<16x16xf32>
    %cst_22 = arith.constant dense<0.000000e+00> : vector<4x16xf32>
    %31 = tpu.matmul %29, %30, %cst_22 {dimension_numbers = #tpu.dot_dimension_numbers<[1], [0], [0], [1], [0, 0, 1, 1], [], []>} : vector<4x16xf32>, vector<16x16xf32>, vector<4x16xf32> -> vector<4x16xf32>
    %32 = arith.addf %0, %31 : vector<4x16xf32>
    %c0_23 = arith.constant 0 : index
    %c0_24 = arith.constant 0 : index
    %33 = vector.load %arg10[%c0_23, %c0_24] : memref<1x16xf32, #tpu.memory_space<vmem>>, vector<1x16xf32>
    %34 = vector.broadcast %33 : vector<1x16xf32> to vector<4x16xf32>
    %35 = arith.addf %32, %34 : vector<4x16xf32>
    %36 = vector.shape_cast %35 : vector<4x16xf32> to vector<1x4x16xf32>
    %cst_25 = arith.constant dense<0.000000e+00> : vector<1xf32>
    %37 = vector.multi_reduction <add>, %36, %cst_25 [1, 2] : vector<1x4x16xf32> to vector<1xf32>
    %38 = vector.shape_cast %37 : vector<1xf32> to vector<1x1x1xf32>
    %39 = vector.extract %38[0, 0, 0] : f32 from vector<1x1x1xf32>
    %cst_26 = arith.constant 6.400000e+01 : f32
    %40 = arith.divf %39, %cst_26 : f32
    %41 = vector.broadcast %40 : f32 to vector<4x16xf32>
    %42 = arith.subf %35, %41 : vector<4x16xf32>
    %43 = arith.mulf %42, %42 : vector<4x16xf32>
    %44 = vector.shape_cast %43 : vector<4x16xf32> to vector<1x4x16xf32>
    %cst_27 = arith.constant dense<0.000000e+00> : vector<1xf32>
    %45 = vector.multi_reduction <add>, %44, %cst_27 [1, 2] : vector<1x4x16xf32> to vector<1xf32>
    %46 = vector.shape_cast %45 : vector<1xf32> to vector<1x1x1xf32>
    %47 = vector.extract %46[0, 0, 0] : f32 from vector<1x1x1xf32>
    %cst_28 = arith.constant 6.400000e+01 : f32
    %48 = arith.divf %47, %cst_28 : f32
    %49 = vector.broadcast %40 : f32 to vector<4x16xf32>
    %50 = arith.subf %35, %49 : vector<4x16xf32>
    %cst_29 = arith.constant 9.99999974E-6 : f32
    %51 = arith.addf %48, %cst_29 : f32
    %52 = math.sqrt %51 : f32
    %53 = vector.broadcast %52 : f32 to vector<4x16xf32>
    %54 = arith.divf %50, %53 : vector<4x16xf32>
    %55 = tpu.iota {dimensions = array<i32: 0>} : vector<8x2xi32>
    %56 = tpu.iota {dimensions = array<i32: 1>} : vector<8x2xi32>
    %c4_i32 = arith.constant 4 : i32
    %57 = vector.broadcast %c4_i32 : i32 to vector<8x2xi32>
    %58 = arith.muli %56, %57 : vector<8x2xi32>
    %59 = arith.cmpi sge, %55, %58 : vector<8x2xi32>
    %c4_i32_30 = arith.constant 4 : i32
    %60 = vector.broadcast %c4_i32_30 : i32 to vector<8x2xi32>
    %61 = arith.muli %56, %60 : vector<8x2xi32>
    %c4_i32_31 = arith.constant 4 : i32
    %62 = vector.broadcast %c4_i32_31 : i32 to vector<8x2xi32>
    %63 = arith.addi %61, %62 : vector<8x2xi32>
    %64 = arith.cmpi slt, %55, %63 : vector<8x2xi32>
    %65 = arith.andi %59, %64 : vector<8x2xi1>
    %66 = arith.extui %65 : vector<8x2xi1> to vector<8x2xi32>
    %67 = arith.sitofp %66 : vector<8x2xi32> to vector<8x2xf32>
    %68 = tpu.iota {dimensions = array<i32: 0>} : vector<2x8xi32>
    %69 = tpu.iota {dimensions = array<i32: 1>} : vector<2x8xi32>
    %c4_i32_32 = arith.constant 4 : i32
    %70 = vector.broadcast %c4_i32_32 : i32 to vector<2x8xi32>
    %71 = arith.muli %68, %70 : vector<2x8xi32>
    %72 = arith.cmpi sge, %69, %71 : vector<2x8xi32>
    %c4_i32_33 = arith.constant 4 : i32
    %73 = vector.broadcast %c4_i32_33 : i32 to vector<2x8xi32>
    %74 = arith.muli %68, %73 : vector<2x8xi32>
    %c4_i32_34 = arith.constant 4 : i32
    %75 = vector.broadcast %c4_i32_34 : i32 to vector<2x8xi32>
    %76 = arith.addi %74, %75 : vector<2x8xi32>
    %77 = arith.cmpi slt, %69, %76 : vector<2x8xi32>
    %78 = arith.andi %72, %77 : vector<2x8xi1>
    %79 = arith.extui %78 : vector<2x8xi1> to vector<2x8xi32>
    %80 = arith.sitofp %79 : vector<2x8xi32> to vector<2x8xf32>
    %81 = tpu.iota {dimensions = array<i32: 0>} : vector<8x4xi32>
    %82 = tpu.iota {dimensions = array<i32: 1>} : vector<8x4xi32>
    %83 = arith.cmpi eq, %81, %82 : vector<8x4xi32>
    %c4_i32_35 = arith.constant 4 : i32
    %84 = vector.broadcast %c4_i32_35 : i32 to vector<8x4xi32>
    %85 = arith.addi %82, %84 : vector<8x4xi32>
    %86 = arith.cmpi eq, %81, %85 : vector<8x4xi32>
    %87 = arith.ori %83, %86 : vector<8x4xi1>
    %88 = arith.extui %87 : vector<8x4xi1> to vector<8x4xi32>
    %89 = arith.sitofp %88 : vector<8x4xi32> to vector<8x4xf32>
    %c0_36 = arith.constant 0 : index
    %c0_37 = arith.constant 0 : index
    %90 = vector.load %arg11[%c0_36, %c0_37] : memref<144x128xf32, #tpu.memory_space<vmem>>, vector<16x128xf32>
    %c16 = arith.constant 16 : index
    %c0_38 = arith.constant 0 : index
    %91 = vector.load %arg11[%c16, %c0_38] : memref<144x128xf32, #tpu.memory_space<vmem>>, vector<16x128xf32>
    %c32 = arith.constant 32 : index
    %c0_39 = arith.constant 0 : index
    %92 = vector.load %arg11[%c32, %c0_39] : memref<144x128xf32, #tpu.memory_space<vmem>>, vector<16x128xf32>
    %c48 = arith.constant 48 : index
    %c0_40 = arith.constant 0 : index
    %93 = vector.load %arg11[%c48, %c0_40] : memref<144x128xf32, #tpu.memory_space<vmem>>, vector<32x128xf32>
    %c80 = arith.constant 80 : index
    %c0_41 = arith.constant 0 : index
    %94 = vector.load %arg11[%c80, %c0_41] : memref<144x128xf32, #tpu.memory_space<vmem>>, vector<32x128xf32>
    %c112 = arith.constant 112 : index
    %c0_42 = arith.constant 0 : index
    %95 = vector.load %arg11[%c112, %c0_42] : memref<144x128xf32, #tpu.memory_space<vmem>>, vector<32x128xf32>
    %c0_43 = arith.constant 0 : index
    %c0_44 = arith.constant 0 : index
    %96 = vector.load %arg13[%c0_43, %c0_44] : memref<1x128xf32, #tpu.memory_space<vmem>>, vector<1x128xf32>
    %c0_45 = arith.constant 0 : index
    %c0_46 = arith.constant 0 : index
    %97 = vector.load %arg0[%c0_45, %c0_46] : memref<2x16xf32, #tpu.memory_space<vmem>>, vector<2x16xf32>
    %cst_47 = arith.constant dense<0.000000e+00> : vector<2x128xf32>
    %98 = tpu.matmul %97, %90, %cst_47 {dimension_numbers = #tpu.dot_dimension_numbers<[1], [0], [0], [1], [0, 0, 1, 1], [], []>} : vector<2x16xf32>, vector<16x128xf32>, vector<2x128xf32> -> vector<2x128xf32>
    %c0_48 = arith.constant 0 : index
    %c0_49 = arith.constant 0 : index
    %99 = vector.load %arg1[%c0_48, %c0_49] : memref<2x16xf32, #tpu.memory_space<vmem>>, vector<2x16xf32>
    %cst_50 = arith.constant dense<0.000000e+00> : vector<2x128xf32>
    %100 = tpu.matmul %99, %91, %cst_50 {dimension_numbers = #tpu.dot_dimension_numbers<[1], [0], [0], [1], [0, 0, 1, 1], [], []>} : vector<2x16xf32>, vector<16x128xf32>, vector<2x128xf32> -> vector<2x128xf32>
    %101 = arith.addf %98, %100 : vector<2x128xf32>
    %cst_51 = arith.constant dense<0.000000e+00> : vector<4x128xf32>
    %102 = tpu.matmul %54, %92, %cst_51 {dimension_numbers = #tpu.dot_dimension_numbers<[1], [0], [0], [1], [0, 0, 1, 1], [], []>} : vector<4x16xf32>, vector<16x128xf32>, vector<4x128xf32> -> vector<4x128xf32>
    %cst_52 = arith.constant dense<0.000000e+00> : vector<8x128xf32>
    %103 = tpu.matmul %67, %101, %cst_52 {dimension_numbers = #tpu.dot_dimension_numbers<[1], [0], [0], [1], [0, 0, 1, 1], [], []>} : vector<8x2xf32>, vector<2x128xf32>, vector<8x128xf32> -> vector<8x128xf32>
    %cst_53 = arith.constant dense<0.000000e+00> : vector<8x128xf32>
    %104 = tpu.matmul %89, %102, %cst_53 {dimension_numbers = #tpu.dot_dimension_numbers<[1], [0], [0], [1], [0, 0, 1, 1], [], []>} : vector<8x4xf32>, vector<4x128xf32>, vector<8x128xf32> -> vector<8x128xf32>
    %105 = arith.addf %103, %104 : vector<8x128xf32>
    %c0_54 = arith.constant 0 : index
    %c0_55 = arith.constant 0 : index
    %106 = vector.load %arg12[%c0_54, %c0_55] : memref<1x128xf32, #tpu.memory_space<vmem>>, vector<1x128xf32>
    %107 = vector.broadcast %106 : vector<1x128xf32> to vector<8x128xf32>
    %108 = arith.addf %105, %107 : vector<8x128xf32>
    %cst_56 = arith.constant 0.000000e+00 : f32
    %109 = vector.broadcast %cst_56 : f32 to vector<8x32xf32>
    %110 = vector.extract_strided_slice %108 {offsets = [0, 0], sizes = [8, 32], strides = [1, 1]} : vector<8x128xf32> to vector<8x32xf32>
    %111 = arith.negf %110 : vector<8x32xf32>
    %112 = math.exp %111 : vector<8x32xf32>
    %cst_57 = arith.constant 1.000000e+00 : f32
    %113 = vector.broadcast %cst_57 : f32 to vector<8x32xf32>
    %114 = arith.addf %113, %112 : vector<8x32xf32>
    %115 = arith.divf %113, %114 : vector<8x32xf32>
    %116 = vector.extract_strided_slice %108 {offsets = [0, 32], sizes = [8, 32], strides = [1, 1]} : vector<8x128xf32> to vector<8x32xf32>
    %117 = arith.negf %116 : vector<8x32xf32>
    %118 = math.exp %117 : vector<8x32xf32>
    %cst_58 = arith.constant 1.000000e+00 : f32
    %119 = vector.broadcast %cst_58 : f32 to vector<8x32xf32>
    %120 = arith.addf %119, %118 : vector<8x32xf32>
    %121 = arith.divf %119, %120 : vector<8x32xf32>
    %122 = vector.extract_strided_slice %108 {offsets = [0, 64], sizes = [8, 32], strides = [1, 1]} : vector<8x128xf32> to vector<8x32xf32>
    %123 = math.tanh %122 : vector<8x32xf32>
    %124 = vector.extract_strided_slice %108 {offsets = [0, 96], sizes = [8, 32], strides = [1, 1]} : vector<8x128xf32> to vector<8x32xf32>
    %125 = arith.negf %124 : vector<8x32xf32>
    %126 = math.exp %125 : vector<8x32xf32>
    %cst_59 = arith.constant 1.000000e+00 : f32
    %127 = vector.broadcast %cst_59 : f32 to vector<8x32xf32>
    %128 = arith.addf %127, %126 : vector<8x32xf32>
    %129 = arith.divf %127, %128 : vector<8x32xf32>
    %130 = arith.mulf %121, %109 : vector<8x32xf32>
    %131 = arith.mulf %115, %123 : vector<8x32xf32>
    %132 = arith.addf %130, %131 : vector<8x32xf32>
    %133 = math.tanh %132 : vector<8x32xf32>
    %134 = arith.mulf %129, %133 : vector<8x32xf32>
    %cst_60 = arith.constant dense<0.000000e+00> : vector<8x128xf32>
    %135 = tpu.matmul %134, %94, %cst_60 {dimension_numbers = #tpu.dot_dimension_numbers<[1], [0], [0], [1], [0, 0, 1, 1], [], []>} : vector<8x32xf32>, vector<32x128xf32>, vector<8x128xf32> -> vector<8x128xf32>
    %136 = vector.broadcast %96 : vector<1x128xf32> to vector<8x128xf32>
    %137 = arith.addf %135, %136 : vector<8x128xf32>
    %138 = vector.extract_strided_slice %137 {offsets = [0, 0], sizes = [8, 32], strides = [1, 1]} : vector<8x128xf32> to vector<8x32xf32>
    %139 = arith.negf %138 : vector<8x32xf32>
    %140 = math.exp %139 : vector<8x32xf32>
    %cst_61 = arith.constant 1.000000e+00 : f32
    %141 = vector.broadcast %cst_61 : f32 to vector<8x32xf32>
    %142 = arith.addf %141, %140 : vector<8x32xf32>
    %143 = arith.divf %141, %142 : vector<8x32xf32>
    %144 = vector.extract_strided_slice %137 {offsets = [0, 32], sizes = [8, 32], strides = [1, 1]} : vector<8x128xf32> to vector<8x32xf32>
    %145 = arith.negf %144 : vector<8x32xf32>
    %146 = math.exp %145 : vector<8x32xf32>
    %cst_62 = arith.constant 1.000000e+00 : f32
    %147 = vector.broadcast %cst_62 : f32 to vector<8x32xf32>
    %148 = arith.addf %147, %146 : vector<8x32xf32>
    %149 = arith.divf %147, %148 : vector<8x32xf32>
    %150 = vector.extract_strided_slice %137 {offsets = [0, 64], sizes = [8, 32], strides = [1, 1]} : vector<8x128xf32> to vector<8x32xf32>
    %151 = math.tanh %150 : vector<8x32xf32>
    %152 = vector.extract_strided_slice %137 {offsets = [0, 96], sizes = [8, 32], strides = [1, 1]} : vector<8x128xf32> to vector<8x32xf32>
    %153 = arith.negf %152 : vector<8x32xf32>
    %154 = math.exp %153 : vector<8x32xf32>
    %cst_63 = arith.constant 1.000000e+00 : f32
    %155 = vector.broadcast %cst_63 : f32 to vector<8x32xf32>
    %156 = arith.addf %155, %154 : vector<8x32xf32>
    %157 = arith.divf %155, %156 : vector<8x32xf32>
    %158 = arith.mulf %149, %109 : vector<8x32xf32>
    %159 = arith.mulf %143, %151 : vector<8x32xf32>
    %160 = arith.addf %158, %159 : vector<8x32xf32>
    %161 = math.tanh %160 : vector<8x32xf32>
    %162 = arith.mulf %157, %161 : vector<8x32xf32>
    %cst_64 = arith.constant dense<0.000000e+00> : vector<8x128xf32>
    %163 = tpu.matmul %134, %93, %cst_64 {dimension_numbers = #tpu.dot_dimension_numbers<[1], [0], [0], [1], [0, 0, 1, 1], [], []>} : vector<8x32xf32>, vector<32x128xf32>, vector<8x128xf32> -> vector<8x128xf32>
    %164 = arith.addf %108, %163 : vector<8x128xf32>
    %165 = vector.extract_strided_slice %164 {offsets = [0, 0], sizes = [8, 32], strides = [1, 1]} : vector<8x128xf32> to vector<8x32xf32>
    %166 = arith.negf %165 : vector<8x32xf32>
    %167 = math.exp %166 : vector<8x32xf32>
    %cst_65 = arith.constant 1.000000e+00 : f32
    %168 = vector.broadcast %cst_65 : f32 to vector<8x32xf32>
    %169 = arith.addf %168, %167 : vector<8x32xf32>
    %170 = arith.divf %168, %169 : vector<8x32xf32>
    %171 = vector.extract_strided_slice %164 {offsets = [0, 32], sizes = [8, 32], strides = [1, 1]} : vector<8x128xf32> to vector<8x32xf32>
    %172 = arith.negf %171 : vector<8x32xf32>
    %173 = math.exp %172 : vector<8x32xf32>
    %cst_66 = arith.constant 1.000000e+00 : f32
    %174 = vector.broadcast %cst_66 : f32 to vector<8x32xf32>
    %175 = arith.addf %174, %173 : vector<8x32xf32>
    %176 = arith.divf %174, %175 : vector<8x32xf32>
    %177 = vector.extract_strided_slice %164 {offsets = [0, 64], sizes = [8, 32], strides = [1, 1]} : vector<8x128xf32> to vector<8x32xf32>
    %178 = math.tanh %177 : vector<8x32xf32>
    %179 = vector.extract_strided_slice %164 {offsets = [0, 96], sizes = [8, 32], strides = [1, 1]} : vector<8x128xf32> to vector<8x32xf32>
    %180 = arith.negf %179 : vector<8x32xf32>
    %181 = math.exp %180 : vector<8x32xf32>
    %cst_67 = arith.constant 1.000000e+00 : f32
    %182 = vector.broadcast %cst_67 : f32 to vector<8x32xf32>
    %183 = arith.addf %182, %181 : vector<8x32xf32>
    %184 = arith.divf %182, %183 : vector<8x32xf32>
    %185 = arith.mulf %176, %132 : vector<8x32xf32>
    %186 = arith.mulf %170, %178 : vector<8x32xf32>
    %187 = arith.addf %185, %186 : vector<8x32xf32>
    %188 = math.tanh %187 : vector<8x32xf32>
    %189 = arith.mulf %184, %188 : vector<8x32xf32>
    %cst_68 = arith.constant dense<0.000000e+00> : vector<8x128xf32>
    %190 = tpu.matmul %189, %94, %cst_68 {dimension_numbers = #tpu.dot_dimension_numbers<[1], [0], [0], [1], [0, 0, 1, 1], [], []>} : vector<8x32xf32>, vector<32x128xf32>, vector<8x128xf32> -> vector<8x128xf32>
    %cst_69 = arith.constant dense<0.000000e+00> : vector<8x128xf32>
    %191 = tpu.matmul %162, %95, %cst_69 {dimension_numbers = #tpu.dot_dimension_numbers<[1], [0], [0], [1], [0, 0, 1, 1], [], []>} : vector<8x32xf32>, vector<32x128xf32>, vector<8x128xf32> -> vector<8x128xf32>
    %192 = arith.addf %190, %191 : vector<8x128xf32>
    %193 = vector.broadcast %96 : vector<1x128xf32> to vector<8x128xf32>
    %194 = arith.addf %192, %193 : vector<8x128xf32>
    %195 = vector.extract_strided_slice %194 {offsets = [0, 0], sizes = [8, 32], strides = [1, 1]} : vector<8x128xf32> to vector<8x32xf32>
    %196 = arith.negf %195 : vector<8x32xf32>
    %197 = math.exp %196 : vector<8x32xf32>
    %cst_70 = arith.constant 1.000000e+00 : f32
    %198 = vector.broadcast %cst_70 : f32 to vector<8x32xf32>
    %199 = arith.addf %198, %197 : vector<8x32xf32>
    %200 = arith.divf %198, %199 : vector<8x32xf32>
    %201 = vector.extract_strided_slice %194 {offsets = [0, 32], sizes = [8, 32], strides = [1, 1]} : vector<8x128xf32> to vector<8x32xf32>
    %202 = arith.negf %201 : vector<8x32xf32>
    %203 = math.exp %202 : vector<8x32xf32>
    %cst_71 = arith.constant 1.000000e+00 : f32
    %204 = vector.broadcast %cst_71 : f32 to vector<8x32xf32>
    %205 = arith.addf %204, %203 : vector<8x32xf32>
    %206 = arith.divf %204, %205 : vector<8x32xf32>
    %207 = vector.extract_strided_slice %194 {offsets = [0, 64], sizes = [8, 32], strides = [1, 1]} : vector<8x128xf32> to vector<8x32xf32>
    %208 = math.tanh %207 : vector<8x32xf32>
    %209 = vector.extract_strided_slice %194 {offsets = [0, 96], sizes = [8, 32], strides = [1, 1]} : vector<8x128xf32> to vector<8x32xf32>
    %210 = arith.negf %209 : vector<8x32xf32>
    %211 = math.exp %210 : vector<8x32xf32>
    %cst_72 = arith.constant 1.000000e+00 : f32
    %212 = vector.broadcast %cst_72 : f32 to vector<8x32xf32>
    %213 = arith.addf %212, %211 : vector<8x32xf32>
    %214 = arith.divf %212, %213 : vector<8x32xf32>
    %215 = arith.mulf %206, %160 : vector<8x32xf32>
    %216 = arith.mulf %200, %208 : vector<8x32xf32>
    %217 = arith.addf %215, %216 : vector<8x32xf32>
    %218 = math.tanh %217 : vector<8x32xf32>
    %219 = arith.mulf %214, %218 : vector<8x32xf32>
    %cst_73 = arith.constant dense<0.000000e+00> : vector<8x128xf32>
    %220 = tpu.matmul %189, %93, %cst_73 {dimension_numbers = #tpu.dot_dimension_numbers<[1], [0], [0], [1], [0, 0, 1, 1], [], []>} : vector<8x32xf32>, vector<32x128xf32>, vector<8x128xf32> -> vector<8x128xf32>
    %221 = arith.addf %108, %220 : vector<8x128xf32>
    %222 = vector.extract_strided_slice %221 {offsets = [0, 0], sizes = [8, 32], strides = [1, 1]} : vector<8x128xf32> to vector<8x32xf32>
    %223 = arith.negf %222 : vector<8x32xf32>
    %224 = math.exp %223 : vector<8x32xf32>
    %cst_74 = arith.constant 1.000000e+00 : f32
    %225 = vector.broadcast %cst_74 : f32 to vector<8x32xf32>
    %226 = arith.addf %225, %224 : vector<8x32xf32>
    %227 = arith.divf %225, %226 : vector<8x32xf32>
    %228 = vector.extract_strided_slice %221 {offsets = [0, 32], sizes = [8, 32], strides = [1, 1]} : vector<8x128xf32> to vector<8x32xf32>
    %229 = arith.negf %228 : vector<8x32xf32>
    %230 = math.exp %229 : vector<8x32xf32>
    %cst_75 = arith.constant 1.000000e+00 : f32
    %231 = vector.broadcast %cst_75 : f32 to vector<8x32xf32>
    %232 = arith.addf %231, %230 : vector<8x32xf32>
    %233 = arith.divf %231, %232 : vector<8x32xf32>
    %234 = vector.extract_strided_slice %221 {offsets = [0, 64], sizes = [8, 32], strides = [1, 1]} : vector<8x128xf32> to vector<8x32xf32>
    %235 = math.tanh %234 : vector<8x32xf32>
    %236 = vector.extract_strided_slice %221 {offsets = [0, 96], sizes = [8, 32], strides = [1, 1]} : vector<8x128xf32> to vector<8x32xf32>
    %237 = arith.negf %236 : vector<8x32xf32>
    %238 = math.exp %237 : vector<8x32xf32>
    %cst_76 = arith.constant 1.000000e+00 : f32
    %239 = vector.broadcast %cst_76 : f32 to vector<8x32xf32>
    %240 = arith.addf %239, %238 : vector<8x32xf32>
    %241 = arith.divf %239, %240 : vector<8x32xf32>
    %242 = arith.mulf %233, %187 : vector<8x32xf32>
    %243 = arith.mulf %227, %235 : vector<8x32xf32>
    %244 = arith.addf %242, %243 : vector<8x32xf32>
    %245 = math.tanh %244 : vector<8x32xf32>
    %246 = arith.mulf %241, %245 : vector<8x32xf32>
    %cst_77 = arith.constant dense<0.000000e+00> : vector<8x128xf32>
    %247 = tpu.matmul %246, %94, %cst_77 {dimension_numbers = #tpu.dot_dimension_numbers<[1], [0], [0], [1], [0, 0, 1, 1], [], []>} : vector<8x32xf32>, vector<32x128xf32>, vector<8x128xf32> -> vector<8x128xf32>
    %cst_78 = arith.constant dense<0.000000e+00> : vector<8x128xf32>
    %248 = tpu.matmul %219, %95, %cst_78 {dimension_numbers = #tpu.dot_dimension_numbers<[1], [0], [0], [1], [0, 0, 1, 1], [], []>} : vector<8x32xf32>, vector<32x128xf32>, vector<8x128xf32> -> vector<8x128xf32>
    %249 = arith.addf %247, %248 : vector<8x128xf32>
    %250 = vector.broadcast %96 : vector<1x128xf32> to vector<8x128xf32>
    %251 = arith.addf %249, %250 : vector<8x128xf32>
    %252 = vector.extract_strided_slice %251 {offsets = [0, 0], sizes = [8, 32], strides = [1, 1]} : vector<8x128xf32> to vector<8x32xf32>
    %253 = arith.negf %252 : vector<8x32xf32>
    %254 = math.exp %253 : vector<8x32xf32>
    %cst_79 = arith.constant 1.000000e+00 : f32
    %255 = vector.broadcast %cst_79 : f32 to vector<8x32xf32>
    %256 = arith.addf %255, %254 : vector<8x32xf32>
    %257 = arith.divf %255, %256 : vector<8x32xf32>
    %258 = vector.extract_strided_slice %251 {offsets = [0, 32], sizes = [8, 32], strides = [1, 1]} : vector<8x128xf32> to vector<8x32xf32>
    %259 = arith.negf %258 : vector<8x32xf32>
    %260 = math.exp %259 : vector<8x32xf32>
    %cst_80 = arith.constant 1.000000e+00 : f32
    %261 = vector.broadcast %cst_80 : f32 to vector<8x32xf32>
    %262 = arith.addf %261, %260 : vector<8x32xf32>
    %263 = arith.divf %261, %262 : vector<8x32xf32>
    %264 = vector.extract_strided_slice %251 {offsets = [0, 64], sizes = [8, 32], strides = [1, 1]} : vector<8x128xf32> to vector<8x32xf32>
    %265 = math.tanh %264 : vector<8x32xf32>
    %266 = vector.extract_strided_slice %251 {offsets = [0, 96], sizes = [8, 32], strides = [1, 1]} : vector<8x128xf32> to vector<8x32xf32>
    %267 = arith.negf %266 : vector<8x32xf32>
    %268 = math.exp %267 : vector<8x32xf32>
    %cst_81 = arith.constant 1.000000e+00 : f32
    %269 = vector.broadcast %cst_81 : f32 to vector<8x32xf32>
    %270 = arith.addf %269, %268 : vector<8x32xf32>
    %271 = arith.divf %269, %270 : vector<8x32xf32>
    %272 = arith.mulf %263, %217 : vector<8x32xf32>
    %273 = arith.mulf %257, %265 : vector<8x32xf32>
    %274 = arith.addf %272, %273 : vector<8x32xf32>
    %275 = math.tanh %274 : vector<8x32xf32>
    %276 = arith.mulf %271, %275 : vector<8x32xf32>
    %cst_82 = arith.constant dense<0.000000e+00> : vector<8x128xf32>
    %277 = tpu.matmul %246, %93, %cst_82 {dimension_numbers = #tpu.dot_dimension_numbers<[1], [0], [0], [1], [0, 0, 1, 1], [], []>} : vector<8x32xf32>, vector<32x128xf32>, vector<8x128xf32> -> vector<8x128xf32>
    %278 = arith.addf %108, %277 : vector<8x128xf32>
    %279 = vector.extract_strided_slice %278 {offsets = [0, 0], sizes = [8, 32], strides = [1, 1]} : vector<8x128xf32> to vector<8x32xf32>
    %280 = arith.negf %279 : vector<8x32xf32>
    %281 = math.exp %280 : vector<8x32xf32>
    %cst_83 = arith.constant 1.000000e+00 : f32
    %282 = vector.broadcast %cst_83 : f32 to vector<8x32xf32>
    %283 = arith.addf %282, %281 : vector<8x32xf32>
    %284 = arith.divf %282, %283 : vector<8x32xf32>
    %285 = vector.extract_strided_slice %278 {offsets = [0, 32], sizes = [8, 32], strides = [1, 1]} : vector<8x128xf32> to vector<8x32xf32>
    %286 = arith.negf %285 : vector<8x32xf32>
    %287 = math.exp %286 : vector<8x32xf32>
    %cst_84 = arith.constant 1.000000e+00 : f32
    %288 = vector.broadcast %cst_84 : f32 to vector<8x32xf32>
    %289 = arith.addf %288, %287 : vector<8x32xf32>
    %290 = arith.divf %288, %289 : vector<8x32xf32>
    %291 = vector.extract_strided_slice %278 {offsets = [0, 64], sizes = [8, 32], strides = [1, 1]} : vector<8x128xf32> to vector<8x32xf32>
    %292 = math.tanh %291 : vector<8x32xf32>
    %293 = vector.extract_strided_slice %278 {offsets = [0, 96], sizes = [8, 32], strides = [1, 1]} : vector<8x128xf32> to vector<8x32xf32>
    %294 = arith.negf %293 : vector<8x32xf32>
    %295 = math.exp %294 : vector<8x32xf32>
    %cst_85 = arith.constant 1.000000e+00 : f32
    %296 = vector.broadcast %cst_85 : f32 to vector<8x32xf32>
    %297 = arith.addf %296, %295 : vector<8x32xf32>
    %298 = arith.divf %296, %297 : vector<8x32xf32>
    %299 = arith.mulf %290, %244 : vector<8x32xf32>
    %300 = arith.mulf %284, %292 : vector<8x32xf32>
    %301 = arith.addf %299, %300 : vector<8x32xf32>
    %302 = math.tanh %301 : vector<8x32xf32>
    %303 = arith.mulf %298, %302 : vector<8x32xf32>
    %cst_86 = arith.constant dense<0.000000e+00> : vector<8x128xf32>
    %304 = tpu.matmul %303, %94, %cst_86 {dimension_numbers = #tpu.dot_dimension_numbers<[1], [0], [0], [1], [0, 0, 1, 1], [], []>} : vector<8x32xf32>, vector<32x128xf32>, vector<8x128xf32> -> vector<8x128xf32>
    %cst_87 = arith.constant dense<0.000000e+00> : vector<8x128xf32>
    %305 = tpu.matmul %276, %95, %cst_87 {dimension_numbers = #tpu.dot_dimension_numbers<[1], [0], [0], [1], [0, 0, 1, 1], [], []>} : vector<8x32xf32>, vector<32x128xf32>, vector<8x128xf32> -> vector<8x128xf32>
    %306 = arith.addf %304, %305 : vector<8x128xf32>
    %307 = vector.broadcast %96 : vector<1x128xf32> to vector<8x128xf32>
    %308 = arith.addf %306, %307 : vector<8x128xf32>
    %309 = vector.extract_strided_slice %308 {offsets = [0, 0], sizes = [8, 32], strides = [1, 1]} : vector<8x128xf32> to vector<8x32xf32>
    %310 = arith.negf %309 : vector<8x32xf32>
    %311 = math.exp %310 : vector<8x32xf32>
    %cst_88 = arith.constant 1.000000e+00 : f32
    %312 = vector.broadcast %cst_88 : f32 to vector<8x32xf32>
    %313 = arith.addf %312, %311 : vector<8x32xf32>
    %314 = arith.divf %312, %313 : vector<8x32xf32>
    %315 = vector.extract_strided_slice %308 {offsets = [0, 32], sizes = [8, 32], strides = [1, 1]} : vector<8x128xf32> to vector<8x32xf32>
    %316 = arith.negf %315 : vector<8x32xf32>
    %317 = math.exp %316 : vector<8x32xf32>
    %cst_89 = arith.constant 1.000000e+00 : f32
    %318 = vector.broadcast %cst_89 : f32 to vector<8x32xf32>
    %319 = arith.addf %318, %317 : vector<8x32xf32>
    %320 = arith.divf %318, %319 : vector<8x32xf32>
    %321 = vector.extract_strided_slice %308 {offsets = [0, 64], sizes = [8, 32], strides = [1, 1]} : vector<8x128xf32> to vector<8x32xf32>
    %322 = math.tanh %321 : vector<8x32xf32>
    %323 = vector.extract_strided_slice %308 {offsets = [0, 96], sizes = [8, 32], strides = [1, 1]} : vector<8x128xf32> to vector<8x32xf32>
    %324 = arith.negf %323 : vector<8x32xf32>
    %325 = math.exp %324 : vector<8x32xf32>
    %cst_90 = arith.constant 1.000000e+00 : f32
    %326 = vector.broadcast %cst_90 : f32 to vector<8x32xf32>
    %327 = arith.addf %326, %325 : vector<8x32xf32>
    %328 = arith.divf %326, %327 : vector<8x32xf32>
    %329 = arith.mulf %320, %274 : vector<8x32xf32>
    %330 = arith.mulf %314, %322 : vector<8x32xf32>
    %331 = arith.addf %329, %330 : vector<8x32xf32>
    %332 = math.tanh %331 : vector<8x32xf32>
    %333 = arith.mulf %328, %332 : vector<8x32xf32>
    %cst_91 = arith.constant dense<0.000000e+00> : vector<8x128xf32>
    %334 = tpu.matmul %303, %93, %cst_91 {dimension_numbers = #tpu.dot_dimension_numbers<[1], [0], [0], [1], [0, 0, 1, 1], [], []>} : vector<8x32xf32>, vector<32x128xf32>, vector<8x128xf32> -> vector<8x128xf32>
    %335 = arith.addf %108, %334 : vector<8x128xf32>
    %336 = vector.extract_strided_slice %335 {offsets = [0, 0], sizes = [8, 32], strides = [1, 1]} : vector<8x128xf32> to vector<8x32xf32>
    %337 = arith.negf %336 : vector<8x32xf32>
    %338 = math.exp %337 : vector<8x32xf32>
    %cst_92 = arith.constant 1.000000e+00 : f32
    %339 = vector.broadcast %cst_92 : f32 to vector<8x32xf32>
    %340 = arith.addf %339, %338 : vector<8x32xf32>
    %341 = arith.divf %339, %340 : vector<8x32xf32>
    %342 = vector.extract_strided_slice %335 {offsets = [0, 32], sizes = [8, 32], strides = [1, 1]} : vector<8x128xf32> to vector<8x32xf32>
    %343 = arith.negf %342 : vector<8x32xf32>
    %344 = math.exp %343 : vector<8x32xf32>
    %cst_93 = arith.constant 1.000000e+00 : f32
    %345 = vector.broadcast %cst_93 : f32 to vector<8x32xf32>
    %346 = arith.addf %345, %344 : vector<8x32xf32>
    %347 = arith.divf %345, %346 : vector<8x32xf32>
    %348 = vector.extract_strided_slice %335 {offsets = [0, 64], sizes = [8, 32], strides = [1, 1]} : vector<8x128xf32> to vector<8x32xf32>
    %349 = math.tanh %348 : vector<8x32xf32>
    %350 = vector.extract_strided_slice %335 {offsets = [0, 96], sizes = [8, 32], strides = [1, 1]} : vector<8x128xf32> to vector<8x32xf32>
    %351 = arith.negf %350 : vector<8x32xf32>
    %352 = math.exp %351 : vector<8x32xf32>
    %cst_94 = arith.constant 1.000000e+00 : f32
    %353 = vector.broadcast %cst_94 : f32 to vector<8x32xf32>
    %354 = arith.addf %353, %352 : vector<8x32xf32>
    %355 = arith.divf %353, %354 : vector<8x32xf32>
    %356 = arith.mulf %347, %301 : vector<8x32xf32>
    %357 = arith.mulf %341, %349 : vector<8x32xf32>
    %358 = arith.addf %356, %357 : vector<8x32xf32>
    %359 = math.tanh %358 : vector<8x32xf32>
    %360 = arith.mulf %355, %359 : vector<8x32xf32>
    %cst_95 = arith.constant dense<0.000000e+00> : vector<8x128xf32>
    %361 = tpu.matmul %360, %94, %cst_95 {dimension_numbers = #tpu.dot_dimension_numbers<[1], [0], [0], [1], [0, 0, 1, 1], [], []>} : vector<8x32xf32>, vector<32x128xf32>, vector<8x128xf32> -> vector<8x128xf32>
    %cst_96 = arith.constant dense<0.000000e+00> : vector<8x128xf32>
    %362 = tpu.matmul %333, %95, %cst_96 {dimension_numbers = #tpu.dot_dimension_numbers<[1], [0], [0], [1], [0, 0, 1, 1], [], []>} : vector<8x32xf32>, vector<32x128xf32>, vector<8x128xf32> -> vector<8x128xf32>
    %363 = arith.addf %361, %362 : vector<8x128xf32>
    %364 = vector.broadcast %96 : vector<1x128xf32> to vector<8x128xf32>
    %365 = arith.addf %363, %364 : vector<8x128xf32>
    %366 = vector.extract_strided_slice %365 {offsets = [0, 0], sizes = [8, 32], strides = [1, 1]} : vector<8x128xf32> to vector<8x32xf32>
    %367 = arith.negf %366 : vector<8x32xf32>
    %368 = math.exp %367 : vector<8x32xf32>
    %cst_97 = arith.constant 1.000000e+00 : f32
    %369 = vector.broadcast %cst_97 : f32 to vector<8x32xf32>
    %370 = arith.addf %369, %368 : vector<8x32xf32>
    %371 = arith.divf %369, %370 : vector<8x32xf32>
    %372 = vector.extract_strided_slice %365 {offsets = [0, 32], sizes = [8, 32], strides = [1, 1]} : vector<8x128xf32> to vector<8x32xf32>
    %373 = arith.negf %372 : vector<8x32xf32>
    %374 = math.exp %373 : vector<8x32xf32>
    %cst_98 = arith.constant 1.000000e+00 : f32
    %375 = vector.broadcast %cst_98 : f32 to vector<8x32xf32>
    %376 = arith.addf %375, %374 : vector<8x32xf32>
    %377 = arith.divf %375, %376 : vector<8x32xf32>
    %378 = vector.extract_strided_slice %365 {offsets = [0, 64], sizes = [8, 32], strides = [1, 1]} : vector<8x128xf32> to vector<8x32xf32>
    %379 = math.tanh %378 : vector<8x32xf32>
    %380 = vector.extract_strided_slice %365 {offsets = [0, 96], sizes = [8, 32], strides = [1, 1]} : vector<8x128xf32> to vector<8x32xf32>
    %381 = arith.negf %380 : vector<8x32xf32>
    %382 = math.exp %381 : vector<8x32xf32>
    %cst_99 = arith.constant 1.000000e+00 : f32
    %383 = vector.broadcast %cst_99 : f32 to vector<8x32xf32>
    %384 = arith.addf %383, %382 : vector<8x32xf32>
    %385 = arith.divf %383, %384 : vector<8x32xf32>
    %386 = arith.mulf %377, %331 : vector<8x32xf32>
    %387 = arith.mulf %371, %379 : vector<8x32xf32>
    %388 = arith.addf %386, %387 : vector<8x32xf32>
    %389 = math.tanh %388 : vector<8x32xf32>
    %390 = arith.mulf %385, %389 : vector<8x32xf32>
    %cst_100 = arith.constant dense<0.000000e+00> : vector<8x128xf32>
    %391 = tpu.matmul %360, %93, %cst_100 {dimension_numbers = #tpu.dot_dimension_numbers<[1], [0], [0], [1], [0, 0, 1, 1], [], []>} : vector<8x32xf32>, vector<32x128xf32>, vector<8x128xf32> -> vector<8x128xf32>
    %392 = arith.addf %108, %391 : vector<8x128xf32>
    %393 = vector.extract_strided_slice %392 {offsets = [0, 0], sizes = [8, 32], strides = [1, 1]} : vector<8x128xf32> to vector<8x32xf32>
    %394 = arith.negf %393 : vector<8x32xf32>
    %395 = math.exp %394 : vector<8x32xf32>
    %cst_101 = arith.constant 1.000000e+00 : f32
    %396 = vector.broadcast %cst_101 : f32 to vector<8x32xf32>
    %397 = arith.addf %396, %395 : vector<8x32xf32>
    %398 = arith.divf %396, %397 : vector<8x32xf32>
    %399 = vector.extract_strided_slice %392 {offsets = [0, 32], sizes = [8, 32], strides = [1, 1]} : vector<8x128xf32> to vector<8x32xf32>
    %400 = arith.negf %399 : vector<8x32xf32>
    %401 = math.exp %400 : vector<8x32xf32>
    %cst_102 = arith.constant 1.000000e+00 : f32
    %402 = vector.broadcast %cst_102 : f32 to vector<8x32xf32>
    %403 = arith.addf %402, %401 : vector<8x32xf32>
    %404 = arith.divf %402, %403 : vector<8x32xf32>
    %405 = vector.extract_strided_slice %392 {offsets = [0, 64], sizes = [8, 32], strides = [1, 1]} : vector<8x128xf32> to vector<8x32xf32>
    %406 = math.tanh %405 : vector<8x32xf32>
    %407 = vector.extract_strided_slice %392 {offsets = [0, 96], sizes = [8, 32], strides = [1, 1]} : vector<8x128xf32> to vector<8x32xf32>
    %408 = arith.negf %407 : vector<8x32xf32>
    %409 = math.exp %408 : vector<8x32xf32>
    %cst_103 = arith.constant 1.000000e+00 : f32
    %410 = vector.broadcast %cst_103 : f32 to vector<8x32xf32>
    %411 = arith.addf %410, %409 : vector<8x32xf32>
    %412 = arith.divf %410, %411 : vector<8x32xf32>
    %413 = arith.mulf %404, %358 : vector<8x32xf32>
    %414 = arith.mulf %398, %406 : vector<8x32xf32>
    %415 = arith.addf %413, %414 : vector<8x32xf32>
    %416 = math.tanh %415 : vector<8x32xf32>
    %417 = arith.mulf %412, %416 : vector<8x32xf32>
    %cst_104 = arith.constant dense<0.000000e+00> : vector<8x128xf32>
    %418 = tpu.matmul %417, %94, %cst_104 {dimension_numbers = #tpu.dot_dimension_numbers<[1], [0], [0], [1], [0, 0, 1, 1], [], []>} : vector<8x32xf32>, vector<32x128xf32>, vector<8x128xf32> -> vector<8x128xf32>
    %cst_105 = arith.constant dense<0.000000e+00> : vector<8x128xf32>
    %419 = tpu.matmul %390, %95, %cst_105 {dimension_numbers = #tpu.dot_dimension_numbers<[1], [0], [0], [1], [0, 0, 1, 1], [], []>} : vector<8x32xf32>, vector<32x128xf32>, vector<8x128xf32> -> vector<8x128xf32>
    %420 = arith.addf %418, %419 : vector<8x128xf32>
    %421 = vector.broadcast %96 : vector<1x128xf32> to vector<8x128xf32>
    %422 = arith.addf %420, %421 : vector<8x128xf32>
    %423 = vector.extract_strided_slice %422 {offsets = [0, 0], sizes = [8, 32], strides = [1, 1]} : vector<8x128xf32> to vector<8x32xf32>
    %424 = arith.negf %423 : vector<8x32xf32>
    %425 = math.exp %424 : vector<8x32xf32>
    %cst_106 = arith.constant 1.000000e+00 : f32
    %426 = vector.broadcast %cst_106 : f32 to vector<8x32xf32>
    %427 = arith.addf %426, %425 : vector<8x32xf32>
    %428 = arith.divf %426, %427 : vector<8x32xf32>
    %429 = vector.extract_strided_slice %422 {offsets = [0, 32], sizes = [8, 32], strides = [1, 1]} : vector<8x128xf32> to vector<8x32xf32>
    %430 = arith.negf %429 : vector<8x32xf32>
    %431 = math.exp %430 : vector<8x32xf32>
    %cst_107 = arith.constant 1.000000e+00 : f32
    %432 = vector.broadcast %cst_107 : f32 to vector<8x32xf32>
    %433 = arith.addf %432, %431 : vector<8x32xf32>
    %434 = arith.divf %432, %433 : vector<8x32xf32>
    %435 = vector.extract_strided_slice %422 {offsets = [0, 64], sizes = [8, 32], strides = [1, 1]} : vector<8x128xf32> to vector<8x32xf32>
    %436 = math.tanh %435 : vector<8x32xf32>
    %437 = vector.extract_strided_slice %422 {offsets = [0, 96], sizes = [8, 32], strides = [1, 1]} : vector<8x128xf32> to vector<8x32xf32>
    %438 = arith.negf %437 : vector<8x32xf32>
    %439 = math.exp %438 : vector<8x32xf32>
    %cst_108 = arith.constant 1.000000e+00 : f32
    %440 = vector.broadcast %cst_108 : f32 to vector<8x32xf32>
    %441 = arith.addf %440, %439 : vector<8x32xf32>
    %442 = arith.divf %440, %441 : vector<8x32xf32>
    %443 = arith.mulf %434, %388 : vector<8x32xf32>
    %444 = arith.mulf %428, %436 : vector<8x32xf32>
    %445 = arith.addf %443, %444 : vector<8x32xf32>
    %446 = math.tanh %445 : vector<8x32xf32>
    %447 = arith.mulf %442, %446 : vector<8x32xf32>
    %cst_109 = arith.constant dense<0.000000e+00> : vector<8x128xf32>
    %448 = tpu.matmul %417, %93, %cst_109 {dimension_numbers = #tpu.dot_dimension_numbers<[1], [0], [0], [1], [0, 0, 1, 1], [], []>} : vector<8x32xf32>, vector<32x128xf32>, vector<8x128xf32> -> vector<8x128xf32>
    %449 = arith.addf %108, %448 : vector<8x128xf32>
    %450 = vector.extract_strided_slice %449 {offsets = [0, 0], sizes = [8, 32], strides = [1, 1]} : vector<8x128xf32> to vector<8x32xf32>
    %451 = arith.negf %450 : vector<8x32xf32>
    %452 = math.exp %451 : vector<8x32xf32>
    %cst_110 = arith.constant 1.000000e+00 : f32
    %453 = vector.broadcast %cst_110 : f32 to vector<8x32xf32>
    %454 = arith.addf %453, %452 : vector<8x32xf32>
    %455 = arith.divf %453, %454 : vector<8x32xf32>
    %456 = vector.extract_strided_slice %449 {offsets = [0, 32], sizes = [8, 32], strides = [1, 1]} : vector<8x128xf32> to vector<8x32xf32>
    %457 = arith.negf %456 : vector<8x32xf32>
    %458 = math.exp %457 : vector<8x32xf32>
    %cst_111 = arith.constant 1.000000e+00 : f32
    %459 = vector.broadcast %cst_111 : f32 to vector<8x32xf32>
    %460 = arith.addf %459, %458 : vector<8x32xf32>
    %461 = arith.divf %459, %460 : vector<8x32xf32>
    %462 = vector.extract_strided_slice %449 {offsets = [0, 64], sizes = [8, 32], strides = [1, 1]} : vector<8x128xf32> to vector<8x32xf32>
    %463 = math.tanh %462 : vector<8x32xf32>
    %464 = vector.extract_strided_slice %449 {offsets = [0, 96], sizes = [8, 32], strides = [1, 1]} : vector<8x128xf32> to vector<8x32xf32>
    %465 = arith.negf %464 : vector<8x32xf32>
    %466 = math.exp %465 : vector<8x32xf32>
    %cst_112 = arith.constant 1.000000e+00 : f32
    %467 = vector.broadcast %cst_112 : f32 to vector<8x32xf32>
    %468 = arith.addf %467, %466 : vector<8x32xf32>
    %469 = arith.divf %467, %468 : vector<8x32xf32>
    %470 = arith.mulf %461, %415 : vector<8x32xf32>
    %471 = arith.mulf %455, %463 : vector<8x32xf32>
    %472 = arith.addf %470, %471 : vector<8x32xf32>
    %473 = math.tanh %472 : vector<8x32xf32>
    %474 = arith.mulf %469, %473 : vector<8x32xf32>
    %cst_113 = arith.constant dense<0.000000e+00> : vector<8x128xf32>
    %475 = tpu.matmul %474, %94, %cst_113 {dimension_numbers = #tpu.dot_dimension_numbers<[1], [0], [0], [1], [0, 0, 1, 1], [], []>} : vector<8x32xf32>, vector<32x128xf32>, vector<8x128xf32> -> vector<8x128xf32>
    %cst_114 = arith.constant dense<0.000000e+00> : vector<8x128xf32>
    %476 = tpu.matmul %447, %95, %cst_114 {dimension_numbers = #tpu.dot_dimension_numbers<[1], [0], [0], [1], [0, 0, 1, 1], [], []>} : vector<8x32xf32>, vector<32x128xf32>, vector<8x128xf32> -> vector<8x128xf32>
    %477 = arith.addf %475, %476 : vector<8x128xf32>
    %478 = vector.broadcast %96 : vector<1x128xf32> to vector<8x128xf32>
    %479 = arith.addf %477, %478 : vector<8x128xf32>
    %480 = vector.extract_strided_slice %479 {offsets = [0, 0], sizes = [8, 32], strides = [1, 1]} : vector<8x128xf32> to vector<8x32xf32>
    %481 = arith.negf %480 : vector<8x32xf32>
    %482 = math.exp %481 : vector<8x32xf32>
    %cst_115 = arith.constant 1.000000e+00 : f32
    %483 = vector.broadcast %cst_115 : f32 to vector<8x32xf32>
    %484 = arith.addf %483, %482 : vector<8x32xf32>
    %485 = arith.divf %483, %484 : vector<8x32xf32>
    %486 = vector.extract_strided_slice %479 {offsets = [0, 32], sizes = [8, 32], strides = [1, 1]} : vector<8x128xf32> to vector<8x32xf32>
    %487 = arith.negf %486 : vector<8x32xf32>
    %488 = math.exp %487 : vector<8x32xf32>
    %cst_116 = arith.constant 1.000000e+00 : f32
    %489 = vector.broadcast %cst_116 : f32 to vector<8x32xf32>
    %490 = arith.addf %489, %488 : vector<8x32xf32>
    %491 = arith.divf %489, %490 : vector<8x32xf32>
    %492 = vector.extract_strided_slice %479 {offsets = [0, 64], sizes = [8, 32], strides = [1, 1]} : vector<8x128xf32> to vector<8x32xf32>
    %493 = math.tanh %492 : vector<8x32xf32>
    %494 = vector.extract_strided_slice %479 {offsets = [0, 96], sizes = [8, 32], strides = [1, 1]} : vector<8x128xf32> to vector<8x32xf32>
    %495 = arith.negf %494 : vector<8x32xf32>
    %496 = math.exp %495 : vector<8x32xf32>
    %cst_117 = arith.constant 1.000000e+00 : f32
    %497 = vector.broadcast %cst_117 : f32 to vector<8x32xf32>
    %498 = arith.addf %497, %496 : vector<8x32xf32>
    %499 = arith.divf %497, %498 : vector<8x32xf32>
    %500 = arith.mulf %491, %445 : vector<8x32xf32>
    %501 = arith.mulf %485, %493 : vector<8x32xf32>
    %502 = arith.addf %500, %501 : vector<8x32xf32>
    %503 = math.tanh %502 : vector<8x32xf32>
    %504 = arith.mulf %499, %503 : vector<8x32xf32>
    %cst_118 = arith.constant dense<0.000000e+00> : vector<8x128xf32>
    %505 = tpu.matmul %474, %93, %cst_118 {dimension_numbers = #tpu.dot_dimension_numbers<[1], [0], [0], [1], [0, 0, 1, 1], [], []>} : vector<8x32xf32>, vector<32x128xf32>, vector<8x128xf32> -> vector<8x128xf32>
    %506 = arith.addf %108, %505 : vector<8x128xf32>
    %507 = vector.extract_strided_slice %506 {offsets = [0, 0], sizes = [8, 32], strides = [1, 1]} : vector<8x128xf32> to vector<8x32xf32>
    %508 = arith.negf %507 : vector<8x32xf32>
    %509 = math.exp %508 : vector<8x32xf32>
    %cst_119 = arith.constant 1.000000e+00 : f32
    %510 = vector.broadcast %cst_119 : f32 to vector<8x32xf32>
    %511 = arith.addf %510, %509 : vector<8x32xf32>
    %512 = arith.divf %510, %511 : vector<8x32xf32>
    %513 = vector.extract_strided_slice %506 {offsets = [0, 32], sizes = [8, 32], strides = [1, 1]} : vector<8x128xf32> to vector<8x32xf32>
    %514 = arith.negf %513 : vector<8x32xf32>
    %515 = math.exp %514 : vector<8x32xf32>
    %cst_120 = arith.constant 1.000000e+00 : f32
    %516 = vector.broadcast %cst_120 : f32 to vector<8x32xf32>
    %517 = arith.addf %516, %515 : vector<8x32xf32>
    %518 = arith.divf %516, %517 : vector<8x32xf32>
    %519 = vector.extract_strided_slice %506 {offsets = [0, 64], sizes = [8, 32], strides = [1, 1]} : vector<8x128xf32> to vector<8x32xf32>
    %520 = math.tanh %519 : vector<8x32xf32>
    %521 = vector.extract_strided_slice %506 {offsets = [0, 96], sizes = [8, 32], strides = [1, 1]} : vector<8x128xf32> to vector<8x32xf32>
    %522 = arith.negf %521 : vector<8x32xf32>
    %523 = math.exp %522 : vector<8x32xf32>
    %cst_121 = arith.constant 1.000000e+00 : f32
    %524 = vector.broadcast %cst_121 : f32 to vector<8x32xf32>
    %525 = arith.addf %524, %523 : vector<8x32xf32>
    %526 = arith.divf %524, %525 : vector<8x32xf32>
    %527 = arith.mulf %518, %472 : vector<8x32xf32>
    %528 = arith.mulf %512, %520 : vector<8x32xf32>
    %529 = arith.addf %527, %528 : vector<8x32xf32>
    %530 = math.tanh %529 : vector<8x32xf32>
    %531 = arith.mulf %526, %530 : vector<8x32xf32>
    %cst_122 = arith.constant dense<0.000000e+00> : vector<8x128xf32>
    %532 = tpu.matmul %531, %94, %cst_122 {dimension_numbers = #tpu.dot_dimension_numbers<[1], [0], [0], [1], [0, 0, 1, 1], [], []>} : vector<8x32xf32>, vector<32x128xf32>, vector<8x128xf32> -> vector<8x128xf32>
    %cst_123 = arith.constant dense<0.000000e+00> : vector<8x128xf32>
    %533 = tpu.matmul %504, %95, %cst_123 {dimension_numbers = #tpu.dot_dimension_numbers<[1], [0], [0], [1], [0, 0, 1, 1], [], []>} : vector<8x32xf32>, vector<32x128xf32>, vector<8x128xf32> -> vector<8x128xf32>
    %534 = arith.addf %532, %533 : vector<8x128xf32>
    %535 = vector.broadcast %96 : vector<1x128xf32> to vector<8x128xf32>
    %536 = arith.addf %534, %535 : vector<8x128xf32>
    %537 = vector.extract_strided_slice %536 {offsets = [0, 0], sizes = [8, 32], strides = [1, 1]} : vector<8x128xf32> to vector<8x32xf32>
    %538 = arith.negf %537 : vector<8x32xf32>
    %539 = math.exp %538 : vector<8x32xf32>
    %cst_124 = arith.constant 1.000000e+00 : f32
    %540 = vector.broadcast %cst_124 : f32 to vector<8x32xf32>
    %541 = arith.addf %540, %539 : vector<8x32xf32>
    %542 = arith.divf %540, %541 : vector<8x32xf32>
    %543 = vector.extract_strided_slice %536 {offsets = [0, 32], sizes = [8, 32], strides = [1, 1]} : vector<8x128xf32> to vector<8x32xf32>
    %544 = arith.negf %543 : vector<8x32xf32>
    %545 = math.exp %544 : vector<8x32xf32>
    %cst_125 = arith.constant 1.000000e+00 : f32
    %546 = vector.broadcast %cst_125 : f32 to vector<8x32xf32>
    %547 = arith.addf %546, %545 : vector<8x32xf32>
    %548 = arith.divf %546, %547 : vector<8x32xf32>
    %549 = vector.extract_strided_slice %536 {offsets = [0, 64], sizes = [8, 32], strides = [1, 1]} : vector<8x128xf32> to vector<8x32xf32>
    %550 = math.tanh %549 : vector<8x32xf32>
    %551 = vector.extract_strided_slice %536 {offsets = [0, 96], sizes = [8, 32], strides = [1, 1]} : vector<8x128xf32> to vector<8x32xf32>
    %552 = arith.negf %551 : vector<8x32xf32>
    %553 = math.exp %552 : vector<8x32xf32>
    %cst_126 = arith.constant 1.000000e+00 : f32
    %554 = vector.broadcast %cst_126 : f32 to vector<8x32xf32>
    %555 = arith.addf %554, %553 : vector<8x32xf32>
    %556 = arith.divf %554, %555 : vector<8x32xf32>
    %557 = arith.mulf %548, %502 : vector<8x32xf32>
    %558 = arith.mulf %542, %550 : vector<8x32xf32>
    %559 = arith.addf %557, %558 : vector<8x32xf32>
    %560 = math.tanh %559 : vector<8x32xf32>
    %561 = arith.mulf %556, %560 : vector<8x32xf32>
    %562 = tpu.concatenate %162, %219, %276, %333, %390, %447, %504, %561 in 1 : vector<8x32xf32>, vector<8x32xf32>, vector<8x32xf32>, vector<8x32xf32>, vector<8x32xf32>, vector<8x32xf32>, vector<8x32xf32>, vector<8x32xf32> -> vector<8x256xf32>
    %c0_127 = arith.constant 0 : index
    %c0_128 = arith.constant 0 : index
    %563 = vector.load %arg14[%c0_127, %c0_128] : memref<256x16xf32, #tpu.memory_space<vmem>>, vector<256x16xf32>
    %cst_129 = arith.constant dense<0.000000e+00> : vector<8x16xf32>
    %564 = tpu.matmul %562, %563, %cst_129 {dimension_numbers = #tpu.dot_dimension_numbers<[1], [0], [0], [1], [0, 0, 1, 1], [], []>} : vector<8x256xf32>, vector<256x16xf32>, vector<8x16xf32> -> vector<8x16xf32>
    %c0_130 = arith.constant 0 : index
    %c0_131 = arith.constant 0 : index
    %565 = vector.load %arg15[%c0_130, %c0_131] : memref<1x16xf32, #tpu.memory_space<vmem>>, vector<1x16xf32>
    %566 = vector.broadcast %565 : vector<1x16xf32> to vector<8x16xf32>
    %567 = arith.addf %564, %566 : vector<8x16xf32>
    %c0_132 = arith.constant 0 : index
    %c0_133 = arith.constant 0 : index
    %568 = vector.load %arg20[%c0_132, %c0_133] : memref<8x16xf32, #tpu.memory_space<vmem>>, vector<8x16xf32>
    tpu.vector_store %arg20[%c0_132, %c0_133], %567 {strides = array<i32>} : memref<8x16xf32, #tpu.memory_space<vmem>>, vector<8x16xf32>,
    %c0_134 = arith.constant 0 : index
    %c0_135 = arith.constant 0 : index
    %569 = vector.load %arg0[%c0_134, %c0_135] : memref<2x16xf32, #tpu.memory_space<vmem>>, vector<2x16xf32>
    %c0_136 = arith.constant 0 : index
    %c0_137 = arith.constant 0 : index
    %570 = vector.load %arg16[%c0_136, %c0_137] : memref<48x32xf32, #tpu.memory_space<vmem>>, vector<16x32xf32>
    %cst_138 = arith.constant dense<0.000000e+00> : vector<2x32xf32>
    %571 = tpu.matmul %569, %570, %cst_138 {dimension_numbers = #tpu.dot_dimension_numbers<[1], [0], [0], [1], [0, 0, 1, 1], [], []>} : vector<2x16xf32>, vector<16x32xf32>, vector<2x32xf32> -> vector<2x32xf32>
    %c0_139 = arith.constant 0 : index
    %c0_140 = arith.constant 0 : index
    %572 = vector.load %arg1[%c0_139, %c0_140] : memref<2x16xf32, #tpu.memory_space<vmem>>, vector<2x16xf32>
    %c16_141 = arith.constant 16 : index
    %c0_142 = arith.constant 0 : index
    %573 = vector.load %arg16[%c16_141, %c0_142] : memref<48x32xf32, #tpu.memory_space<vmem>>, vector<16x32xf32>
    %cst_143 = arith.constant dense<0.000000e+00> : vector<2x32xf32>
    %574 = tpu.matmul %572, %573, %cst_143 {dimension_numbers = #tpu.dot_dimension_numbers<[1], [0], [0], [1], [0, 0, 1, 1], [], []>} : vector<2x16xf32>, vector<16x32xf32>, vector<2x32xf32> -> vector<2x32xf32>
    %575 = arith.addf %571, %574 : vector<2x32xf32>
    %c32_144 = arith.constant 32 : index
    %c0_145 = arith.constant 0 : index
    %576 = vector.load %arg16[%c32_144, %c0_145] : memref<48x32xf32, #tpu.memory_space<vmem>>, vector<16x32xf32>
    %cst_146 = arith.constant dense<0.000000e+00> : vector<4x32xf32>
    %577 = tpu.matmul %54, %576, %cst_146 {dimension_numbers = #tpu.dot_dimension_numbers<[1], [0], [0], [1], [0, 0, 1, 1], [], []>} : vector<4x16xf32>, vector<16x32xf32>, vector<4x32xf32> -> vector<4x32xf32>
    %cst_147 = arith.constant dense<0.000000e+00> : vector<8x32xf32>
    %578 = tpu.matmul %67, %575, %cst_147 {dimension_numbers = #tpu.dot_dimension_numbers<[1], [0], [0], [1], [0, 0, 1, 1], [], []>} : vector<8x2xf32>, vector<2x32xf32>, vector<8x32xf32> -> vector<8x32xf32>
    %cst_148 = arith.constant dense<0.000000e+00> : vector<8x32xf32>
    %579 = tpu.matmul %89, %577, %cst_148 {dimension_numbers = #tpu.dot_dimension_numbers<[1], [0], [0], [1], [0, 0, 1, 1], [], []>} : vector<8x4xf32>, vector<4x32xf32>, vector<8x32xf32> -> vector<8x32xf32>
    %580 = arith.addf %578, %579 : vector<8x32xf32>
    %c0_149 = arith.constant 0 : index
    %c0_150 = arith.constant 0 : index
    %581 = vector.load %arg17[%c0_149, %c0_150] : memref<1x32xf32, #tpu.memory_space<vmem>>, vector<1x32xf32>
    %582 = vector.broadcast %581 : vector<1x32xf32> to vector<8x32xf32>
    %583 = arith.addf %580, %582 : vector<8x32xf32>
    %cst_151 = arith.constant 0.000000e+00 : f32
    %584 = vector.broadcast %cst_151 : f32 to vector<8x32xf32>
    %585 = arith.cmpf ogt, %583, %584 : vector<8x32xf32>
    %cst_152 = arith.constant 0.00999999977 : f32
    %586 = vector.broadcast %cst_152 : f32 to vector<8x32xf32>
    %587 = arith.mulf %586, %583 : vector<8x32xf32>
    %588 = arith.select %585, %583, %587 : vector<8x32xi1>, vector<8x32xf32>
    %c0_153 = arith.constant 0 : index
    %c0_154 = arith.constant 0 : index
    %589 = vector.load %arg18[%c0_153, %c0_154] : memref<32x1xf32, #tpu.memory_space<vmem>>, vector<32x1xf32>
    %cst_155 = arith.constant dense<0.000000e+00> : vector<8x1xf32>
    %590 = tpu.matmul %588, %589, %cst_155 {dimension_numbers = #tpu.dot_dimension_numbers<[1], [0], [0], [1], [0, 0, 1, 1], [], []>} : vector<8x32xf32>, vector<32x1xf32>, vector<8x1xf32> -> vector<8x1xf32>
    %c0_156 = arith.constant 0 : index
    %c0_157 = arith.constant 0 : index
    %591 = vector.load %arg19[%c0_156, %c0_157] : memref<1x1xf32, #tpu.memory_space<vmem>>, vector<1x1xf32>
    %592 = vector.broadcast %591 : vector<1x1xf32> to vector<8x1xf32>
    %593 = arith.addf %590, %592 : vector<8x1xf32>
    %594 = vector.shape_cast %593 : vector<8x1xf32> to vector<1x8x1xf32>
    %cst_158 = arith.constant dense<0xFF800000> : vector<1xf32>
    %595 = vector.multi_reduction <maximumf>, %594, %cst_158 [1, 2] : vector<1x8x1xf32> to vector<1xf32>
    %596 = vector.shape_cast %595 : vector<1xf32> to vector<1x1x1xf32>
    %597 = vector.extract %596[0, 0, 0] : f32 from vector<1x1x1xf32>
    %598 = vector.broadcast %597 : f32 to vector<8x1xf32>
    %599 = arith.subf %593, %598 : vector<8x1xf32>
    %600 = math.exp %599 : vector<8x1xf32>
    %cst_159 = arith.constant dense<0.000000e+00> : vector<2x1xf32>
    %601 = tpu.matmul %80, %600, %cst_159 {dimension_numbers = #tpu.dot_dimension_numbers<[1], [0], [0], [1], [0, 0, 1, 1], [], []>} : vector<2x8xf32>, vector<8x1xf32>, vector<2x1xf32> -> vector<2x1xf32>
    %cst_160 = arith.constant dense<0.000000e+00> : vector<8x1xf32>
    %602 = tpu.matmul %67, %601, %cst_160 {dimension_numbers = #tpu.dot_dimension_numbers<[1], [0], [0], [1], [0, 0, 1, 1], [], []>} : vector<8x2xf32>, vector<2x1xf32>, vector<8x1xf32> -> vector<8x1xf32>
    %603 = arith.divf %600, %602 : vector<8x1xf32>
    %c0_161 = arith.constant 0 : index
    %c0_162 = arith.constant 0 : index
    %604 = vector.load %arg21[%c0_161, %c0_162] : memref<8x1xf32, #tpu.memory_space<vmem>>, vector<8x1xf32>
    tpu.vector_store %arg21[%c0_161, %c0_162], %603 {strides = array<i32>} : memref<8x1xf32, #tpu.memory_space<vmem>>, vector<8x1xf32>,
    return
  }
}

</mosaic_0001>

<bundles_post_ra>
// kernel: trajectory_decoder_forward.1
= control target key start
LH: loop header
LB: loop body
LE: loop exit
PB: predicated region body
PF: predicated region fallthrough
CT: control target
= control target key end

     0   :  { %v4628_v0 = vmov 0.0   ;;  %vm79_vm0 = vcmask 130048   ;;  %vm4629_vm1 = vmmov 0   ;;  %vm388_vm2 = vcmask 27648   ;;  %s5598_s4 = inlined_call_operand.vmem [shape: f32[16,16], index: 4, kind: input, shape index: {}]   ;;  %s5599_s3 = inlined_call_operand.vmem [shape: f32[16,16], index: 3, kind: input, shape index: {}]   ;;  %s5600_s2 = inlined_call_operand.vmem [shape: f32[4,16], index: 2, kind: input, shape index: {}]   ;;  %s5601_s7 = inlined_call_operand.vmem [shape: f32[1,16], index: 7, kind: input, shape index: {}]   ;;  %s5602_s6 = inlined_call_operand.vmem [shape: f32[1,16], index: 6, kind: input, shape index: {}]   ;;  %s5603_s5 = inlined_call_operand.vmem [shape: f32[16,16], index: 5, kind: input, shape index: {}]   ;;  %s5604_s8 = inlined_call_operand.vmem [shape: f32[1,16], index: 8, kind: input, shape index: {}]   ;;  %s5605_s9 = inlined_call_operand.vmem [shape: f32[16,16], index: 9, kind: input, shape index: {}]   ;;  %s5606_s10 = inlined_call_operand.vmem [shape: f32[1,16], index: 10, kind: input, shape index: {}]   ;;  %s5607_s11 = inlined_call_operand.vmem [shape: f32[144,128], index: 11, kind: input, shape index: {}]   ;;  %s5608_s1 = inlined_call_operand.vmem [shape: f32[2,16], index: 1, kind: input, shape index: {}]   ;;  %s5609_s0 = inlined_call_operand.vmem [shape: f32[2,16], index: 0, kind: input, shape index: {}]   ;;  %s5610_s12 = inlined_call_operand.vmem [shape: f32[1,128], index: 12, kind: input, shape index: {}]   ;;  %s5611_s13 = inlined_call_operand.vmem [shape: f32[1,128], index: 13, kind: input, shape index: {}]   ;;  %s5612_s16 = inlined_call_operand.vmem [shape: f32[48,32], index: 16, kind: input, shape index: {}]   ;;  %s5613_s18 = inlined_call_operand.vmem [shape: f32[32,1], index: 18, kind: input, shape index: {}]   ;;  %s5614_s17 = inlined_call_operand.vmem [shape: f32[1,32], index: 17, kind: input, shape index: {}]   ;;  %s5615_s19 = inlined_call_operand.<no memory space> [shape: f32[1,1], index: 19, kind: input, shape index: {}]   ;;  %s5616_s14 = inlined_call_operand.vmem [shape: f32[256,16], index: 14, kind: input, shape index: {}]   ;;  %s5617_s15 = inlined_call_operand.vmem [shape: f32[1,16], index: 15, kind: input, shape index: {}]   ;;  %s5618_s20 = inlined_call_operand.vmem [shape: f32[8,16], index: 20, kind: output, shape index: {0}]   ;;  %s5619_s21 = inlined_call_operand.vmem [shape: f32[8,1], index: 21, kind: output, shape index: {1}]  }
   0x1   :  { %5623 = sst [smem:[#allocation3_spill]] %s5598_s4  ;;  %4100 = vmatprep.subr.mxu1 %v4628_v0  ;;  %4093 = vmatprep.subr.mxu0 %v4628_v0  ;;  %v3825_v26 = vld [vmem:[%s5604_s8] ss:$0 sm:$0xff]  ;;  %vm404_vm3 = vcmask 1043456   ;;  %v479_v29 = vld [vmem:[%s5605_s9 + $0x8] sm:$0xff]  ;;  %vm400_vm4 = vcmask 31744  }
   0x2   :  { %5624 = sst [smem:[#allocation4_spill]] %s5599_s3  ;;  %4104 = vmatprep.mubr.msk.f32.mxu1 %vm4629_vm1, %v4628_v0  ;;  %4097 = vmatprep.mubr.msk.f32.mxu0 %vm4629_vm1, %v4628_v0  ;;  %v478_v33 = vld [vmem:[%s5605_s9] sm:$0xff]  ;;  %vm562_vm5 = vcmask 125952   ;;  %v632_v59 = vld [vmem:[%s5607_s11 + $0x18] sm:$0xff]  ;;  %v631_v60 = vld [vmem:[%s5607_s11 + $0x10] sm:$0xff]  ;;  %vm949_vm8 = vcmask 1041408  }
   0x3   :  { %5625 = sst [smem:[#allocation5_spill]] %s5600_s2  ;;  %v3832_v37 = vld [vmem:[%s5606_s10] ss:$0 sm:$0xff]  ;;  %v630_v61 = vld [vmem:[%s5607_s11 + $0x8] sm:$0xff]  ;;  %vm945_vm12 = vcmask 15360  }
   0x4   :  { %5626 = sst [smem:[#allocation6_spill]] %s5601_s7  ;;  %v649_v63 = vld [vmem:[%s5608_s1] sm:$0x3] }
   0x5   :  { %5627 = sst [smem:[#allocation7_spill]] %s5602_s6 }
   0x6   :  { %5628 = sst [smem:[#allocation8_spill]] %s5603_s5  ;;  %s4632_s5 = smov 96  }
   0x7   :  { %s5629_s26 = sld [smem:[#allocation3_spill]] }
   0x8   :  { %s5630_s28 = sld [smem:[#allocation4_spill]] }
   0x9   :  { %s5631_s23 = sld [smem:[#allocation5_spill]] }
   0xa   :  { %s5632_s2 = sld [smem:[#allocation6_spill]] }
   0xb   :  { %s5633_s27 = sld [smem:[#allocation7_spill]] }
   0xc   :  { %s5634_s29 = sld [smem:[#allocation8_spill]] }
   0xd   :  { %v154_v1 = vld [vmem:[%s5629_s26 + $0x8] sm:$0xff]  ;;  %v153_v3 = vld [vmem:[%s5629_s26] sm:$0xff] }
   0xe   :  { %v71_v2 = vld [vmem:[%s5630_s28 + $0x8] sm:$0xff]  ;;  %4101 = vmatpush3.msra.mxu1 %v154_v1  ;;  %v70_v4 = vld [vmem:[%s5630_s28] sm:$0xff]  ;;  %s4630_s28 = smov 64  }
   0xf   :  { %4094 = vmatpush3.msra.mxu0 %v71_v2  ;;  %4102 = vmatprep.subr.mxu1 %v4628_v0  ;;  %v4762_v5 = vld [vmem:[%s5631_s23] sm:$0xf] }
  0x10   :  { %4095 = vmatprep.subr.mxu0 %v4628_v0  ;;  %4103 = vmatpush3.msra.mxu1 %v153_v3  ;;  %v3823_v6 = vld [vmem:[%s5632_s2] ss:$0 sm:$0xff]  ;;  %v634_v3 = vld [vmem:[%s5607_s11 + $0x28] sm:$0xff] }
  0x11   :  { %4096 = vmatpush3.msra.mxu0 %v70_v4  ;;  %4105 = vmatmul.mubr.msk.f32.vlgmr.msra.gmra.mxu1 %vm79_vm0, %v4762_v5  ;;  %v3821_v7 = vld [vmem:[%s5633_s27] ss:$0 sm:$0xff] }
  0x12   :  { %4098 = vmatmul.mubr.msk.f32.vlgmr.msra.gmra.mxu0 %vm79_vm0, %v4762_v5  ;;  %4114 = vmatprep.subr.mxu1 %v4628_v0  ;;  %v233_v14 = vld [vmem:[%s5634_s29 + $0x8] sm:$0xff]  ;;  %v232_v15 = vld [vmem:[%s5634_s29] sm:$0xff] }
  0x13   :  { %4116 = vmatprep.mubr.msk.f32.mxu1 %vm4629_vm1, %v4628_v0  ;;  %4107 = vmatprep.subr.mxu0 %v4628_v0  ;;  %v629_v1 = vld [vmem:[%s5607_s11] sm:$0xff] }
  0x14   :  { %4111 = vmatprep.mubr.msk.f32.mxu0 %vm4629_vm1, %v4628_v0  ;;  %4108 = vmatpush3.msra.mxu0 %v233_v14  ;;  %v648_v2 = vld [vmem:[%s5609_s0] sm:$0x3] }
  0x15   :  { %4109 = vmatprep.subr.mxu0 %v4628_v0  ;;  %v633_v4 = vld [vmem:[%s5607_s11 + $0x20] sm:$0xff] }
  0x16   :  { %4110 = vmatpush3.msra.mxu0 %v232_v15 }
  0x17   :  { %4112 = vmatmul.mubr.msk.f32.vlgmr.msra.gmra.mxu0 %vm79_vm0, %v4762_v5  ;;  %4119 = vmatprep.subr.mxu0 %v4628_v0 }
  0x18   :  { %4121 = vmatprep.mubr.msk.f32.mxu0 %vm4629_vm1, %v4628_v0 }
  0xd1   :  { %v228_v8 = vpop.f32.mrf.mxu1 }
  0xd2   :  { %v149_v9 = vpop.f32.mrf.mxu0  ;;  %v229_v10 = vadd.f32 %v3823_v6, %v228_v8 }
  0xd3   :  { %v150_v11 = vadd.f32 %v3821_v7, %v149_v9  ;;  %v4106_v12 = vpop.f32.mrf.mxu1 }
  0xd4   :  { %v4099_v13 = vpop.f32.mrf.mxu0  ;;  %4115 = vmatpush3.xpose.msk.msra.mxu1 %vm79_vm0, %v229_v10 }
  0xd5   :  { %4124 = vmatprep.subr.mxu1 %v4628_v0 }
  0xd7   :  { %4117 = vmatmul.mubr.msk.f32.vlgmr.msra.gmra.mxu1 %vm79_vm0, %v150_v11  ;;  %v307_v25 = vpop.f32.mrf.mxu0 }
  0xd8   :  { %4128 = vmatprep.mubr.msk.f32.mxu1 %vm4629_vm1, %v4628_v0  ;;  %v308_v27 = vadd.f32 %v3825_v26, %v307_v25  ;;  %4125 = vmatpush3.msra.mxu1 %v479_v29 }
  0xd9   :  { %v4113_v28 = vpop.f32.mrf.mxu0  ;;  %4126 = vmatprep.subr.mxu1 %v4628_v0 }
  0xda   :  { %4120 = vmatpush3.msk.msra.mxu0 %vm404_vm3, %v308_v27  ;;  %4127 = vmatpush3.msra.mxu1 %v478_v33 }
  0xdb   :  { %4131 = vmatprep.subr.mxu0 %v4628_v0  ;;  %4138 = vmatprep.subr.mxu1 %v4628_v0 }
 0x197   :  { %v383_v16 = vpop.f32.mrf.mxu1 }
 0x198   :  { %v387_v17 = vmul.f32 0.25, %v383_v16  ;;  %v605_v16 = vlaneseq }
 0x199   :  { %v4118_v18 = vpop.f32.mrf.mxu1 }
 0x19a   :  { %v389_v19 = vsel %vm388_vm2, %v387_v17, -inf }
 0x19b   :  { %390 = vmax.xlane.f32.xlu0 %v389_v19 }
 0x224   :  { %v391_v20 = vpop.xlane.xlu0 %390 }
 0x225   :  { %v392_v21 = vsub.f32 %v387_v17, %v391_v20  ;;  %v4868_v20 = vand.u32 127, %v605_v16 }
 0x227   :  { %v393_v22 = vmul.f32 1.442695, %v392_v21  ;;  %v609_v21 = vmul.u32 4, %v4868_v20  ;;  %v624_v25 = vadd.s32 4, %v4868_v20 }
 0x229   :  { %4479 = vpow2.f32 %v393_v22  ;;  %v4873_v22 = vshrl.u32 %v605_v16, 7 }
 0x22b   :  { %vm610_vm9 = vcmp.ge.s32.totalorder %v4873_v22, %v609_v21  ;;  %vm623_vm13 = vcmp.eq.s32.totalorder %v4873_v22, %v4868_v20  ;;  %vm625_vm14 = vcmp.eq.s32.totalorder %v4873_v22, %v624_v25 }
 0x22c   :  { %vm626_vm15 = vmor %vm623_vm13, %vm625_vm14 }
 0x22d   :  { %v4889_v26 = vsel %vm626_vm15, 1.0, %v4628_v0 }
 0x236   :  { %v4480_v23 = vpop.eup %4479 }
 0x237   :  { %v395_v24 = vsel %vm388_vm2, %v4480_v23, 0.0  ;;  %vm1064_vm2 = vcmask 261120  }
 0x238   :  { %396 = vadd.xlane.f32.xlu0 %v395_v24 }
 0x2c1   :  { %v397_v30 = vpop.xlane.xlu0 %396 }
 0x2c2   :  { %4481 = vrcp.f32 %v397_v30 }
 0x2cf   :  { %v4482_v31 = vpop.eup %4481 }
 0x2d0   :  { %v399_v32 = vmul.f32 %v4482_v31, %v4480_v23  ;;  %v611_v23 = vadd.s32 4, %v609_v21 }
 0x2d2   :  { %4122 = vmatmul.mubr.msk.f32.vlgmr.msra.gmra.mxu0 %vm400_vm4, %v399_v32  ;;  %vm612_vm10 = vcmp.lt.s32.totalorder %v4873_v22, %v611_v23  ;;  %v3843_v32 = vld [vmem:[%s5610_s12] ss:$0 sm:$0xff]  ;;  %s4631_s12 = smov 32  }
 0x2d3   :  { %4135 = vmatprep.mubr.msk.f32.mxu0 %vm4629_vm1, %v4628_v0  ;;  %4132 = vmatpush3.msra.mxu0 %v632_v59  ;;  %vm613_vm11 = vmand %vm610_vm9, %vm612_vm10  ;;  %vm3663_vm9 = vcmask 64512   ;;  %vm3066_vm10 = vcmask 523264  }
 0x2d4   :  { %4133 = vmatprep.subr.mxu0 %v4628_v0  ;;  %v4878_v24 = vsel %vm613_vm11, 1.0, %v4628_v0  ;;  %vm3068_vm11 = vcmask 785408  }
 0x2d5   :  { %4134 = vmatpush3.msra.mxu0 %v631_v60 }
 0x2d6   :  { %4136 = vmatmul.mubr.msk.f32.vlgmr.msra.gmra.mxu0 %vm79_vm0, %v649_v63  ;;  %4145 = vmatprep.subr.mxu0 %v4628_v0 }
 0x2d7   :  { %4149 = vmatprep.mubr.msk.f32.mxu0 %vm4629_vm1, %v4628_v0  ;;  %4146 = vmatpush3.msra.mxu0 %v634_v3 }
 0x2d8   :  { %4147 = vmatprep.subr.mxu0 %v4628_v0 }
 0x2d9   :  { %4148 = vmatpush3.msra.mxu0 %v633_v4 }
 0x2da   :  { %4157 = vmatprep.subr.mxu0 %v4628_v0 }
 0x392   :  { %v474_v34 = vpop.f32.mrf.mxu0 }
 0x393   :  { %4129 = vmatmul.mubr.msk.f32.vlgmr.msra.gmra.mxu1 %vm79_vm0, %v474_v34 }
 0x394   :  { %v4123_v35 = vpop.f32.mrf.mxu0  ;;  %4142 = vmatprep.mubr.msk.f32.mxu1 %vm4629_vm1, %v4628_v0  ;;  %4139 = vmatpush3.msra.mxu1 %v630_v61 }
 0x395   :  { %4140 = vmatprep.subr.mxu1 %v4628_v0 }
 0x396   :  { %4141 = vmatpush3.msra.mxu1 %v629_v1  ;;  %v719_v14 = vpop.f32.mrf.mxu0 }
 0x397   :  { %4143 = vmatmul.mubr.msk.f32.vlgmr.msra.gmra.mxu1 %vm79_vm0, %v648_v2  ;;  %4152 = vmatprep.subr.mxu1 %v4628_v0 }
 0x398   :  { %4154 = vmatprep.mubr.msk.f32.mxu1 %vm4629_vm1, %v4628_v0  ;;  %v4137_v18 = vpop.f32.mrf.mxu0 }
 0x453   :  { %v549_v36 = vpop.f32.mrf.mxu1 }
 0x454   :  { %v553_v38 = vadd.f32 %v549_v36, %v4762_v5 }
 0x455   :  { %v4130_v39 = vpop.f32.mrf.mxu1 }
 0x456   :  { %v561_v40 = vadd.f32 %v3832_v37, %v553_v38 }
 0x457   :  { %v792_v15 = vpop.f32.mrf.mxu1 }
 0x458   :  { %v563_v41 = vsel %vm562_vm5, %v561_v40, 0.0  ;;  %v793_v17 = vadd.f32 %v792_v15, %v719_v14 }
 0x459   :  { %564 = vadd.xlane.f32.xlu1 %v563_v41  ;;  %v4144_v19 = vpop.f32.mrf.mxu1 }
 0x4e2   :  { %v565_v42 = vpop.xlane.xlu1 %564 }
 0x4e3   :  { %v566_v43 = vrot.slane %v565_v42, 4 }
 0x4e5   :  { %v567_v44 = vadd.f32 %v566_v43, %v565_v42 }
 0x4e7   :  { %v568_v45 = vrot.slane %v567_v44, 2 }
 0x4e9   :  { %v569_v46 = vadd.f32 %v568_v45, %v567_v44 }
 0x4eb   :  { %v570_v47 = vrot.slane %v569_v46, 1 }
 0x4ed   :  { %v571_v48 = vadd.f32 %v570_v47, %v569_v46  ;;  %v4912_v46 = vld [vmem:[%s5607_s11 + $0x68] sm:$0xff] }
 0x4ee   :  { %v4917_v47 = vld [vmem:[%s5607_s11 + $0x48] sm:$0xff] }
 0x4ef   :  { %4456 = vpush %v571_v48  ;;  %v4922_v48 = vld [vmem:[%s5607_s11 + $0x60] sm:$0xff] }
 0x520   :  { %s4457_s9 = spop %4456 }
 0x521   :  { %s575_s25 = smul.f32 0.015625, %s4457_s9 }
 0x523   :  { %v576_v49 = vstv %s575_s25 }
 0x524   :  { %v577_v50 = vsub.f32 %v561_v40, %v576_v49  ;;  %v4929_v49 = vld [vmem:[%s5607_s11 + $0x40] sm:$0xff] }
 0x526   :  { %v578_v51 = vmul.f32 %v577_v50, %v577_v50 }
 0x528   :  { %v579_v52 = vsel %vm562_vm5, %v578_v51, 0.0  ;;  %v4941_v51 = vld [vmem:[%s5607_s11 + $0x38] sm:$0xff] }
 0x529   :  { %580 = vadd.xlane.f32.xlu1 %v579_v52  ;;  %v4950_v52 = vld [vmem:[%s5607_s11 + $0x50] sm:$0xff] }
 0x5b2   :  { %v581_v53 = vpop.xlane.xlu1 %580 }
 0x5b3   :  { %v582_v54 = vrot.slane %v581_v53, 4 }
 0x5b5   :  { %v583_v55 = vadd.f32 %v582_v54, %v581_v53  ;;  %v4955_v53 = vld [vmem:[%s5607_s11 + $0x30] sm:$0xff] }
 0x5b7   :  { %v584_v56 = vrot.slane %v583_v55, 2 }
 0x5b9   :  { %v585_v57 = vadd.f32 %v584_v56, %v583_v55 }
 0x5bb   :  { %v586_v58 = vrot.slane %v585_v57, 1 }
 0x5bd   :  { %v587_v62 = vadd.f32 %v586_v58, %v585_v57  ;;  %v4984_v58 = vld [vmem:[%s5611_s13] ss:$0 sm:$0xff] }
 0x5bf   :  { %4458 = vpush %v587_v62 }
 0x5f0   :  { %s4459_s9 = spop %4458 }
 0x5f1   :  { %s591_s25 = smul.f32 0.015625, %s4459_s9 }
 0x5f3   :  { %s592_s10 = sadd.f32 1e-05, %s591_s25 }
 0x5f5   :  { %v593_v5 = vstv %s592_s10 }
 0x5f6   :  { %4483 = vrsqrt.f32 %v593_v5  ;;  %vm596_vm6 = vcmp.eq.f32.partialorder %v593_v5, inf  ;;  %v599_v8 = vand.u32 2147483648, %v593_v5  ;;  %vm598_vm7 = vcmp.eq.f32.partialorder %v593_v5, 0.0 }
 0x603   :  { %v4484_v6 = vpop.eup %4483 }
 0x604   :  { %v595_v7 = vmul.f32 %v4484_v6, %v593_v5 }
 0x606   :  { %v597_v9 = vsel %vm596_vm6, %v593_v5, %v595_v7 }
 0x607   :  { %v600_v10 = vsel %vm598_vm7, %v599_v8, %v597_v9 }
 0x608   :  { %4460 = vpush %v600_v10 }
 0x639   :  { %s4461_s26 = spop %4460 }
 0x63a   :  { %v602_v11 = vstv %s4461_s26 }
 0x63b   :  { %4485 = vrcp.f32 %v602_v11 }
 0x648   :  { %v4486_v12 = vpop.eup %4485 }
 0x649   :  { %v4862_v13 = vmul.f32 %v4486_v12, %v577_v50  ;;  %v4936_v50 = vld [vmem:[%s5607_s11 + $0x58] sm:$0xff] }
 0x64b   :  { %4150 = vmatmul.mubr.msk.f32.vlgmr.msra.gmra.mxu0 %vm79_vm0, %v4862_v13 }
 0x64c   :  { %4159 = vmatprep.mubr.msk.f32.mxu0 %vm4629_vm1, %v4628_v0  ;;  %4158 = vmatpush3.msk.msra.mxu0 %vm949_vm8, %v793_v17 }
 0x64d   :  { %4173 = vmatprep.subr.mxu0 %v4628_v0 }
 0x64f   :  { %4160 = vmatmul.mubr.msk.f32.vlgmr.msra.gmra.mxu0 %vm945_vm12, %v4878_v24 }
 0x650   :  { %4181 = vmatprep.mubr.msk.f32.mxu0 %vm4629_vm1, %v4628_v0  ;;  %4174 = vmatpush3.msra.mxu0 %v4917_v47 }
 0x651   :  { %4175 = vmatprep.subr.mxu0 %v4628_v0 }
 0x652   :  { %4176 = vmatpush3.msra.mxu0 %v4929_v49 }
 0x653   :  { %4177 = vmatprep.subr.mxu0 %v4628_v0 }
 0x654   :  { %4178 = vmatpush3.msra.mxu0 %v4941_v51 }
 0x655   :  { %4179 = vmatprep.subr.mxu0 %v4628_v0 }
 0x656   :  { %4180 = vmatpush3.msra.mxu0 %v4955_v53 }
 0x657   :  { %4195 = vmatprep.subr.mxu0 %v4628_v0 }
 0x70b   :  { %v865_v27 = vpop.f32.mrf.mxu0 }
 0x70c   :  { %4153 = vmatpush3.msk.msra.mxu1 %vm404_vm3, %v865_v27  ;;  %v5002_v27 = vld [vmem:[%s5607_s11 + $0x88] sm:$0xff] }
 0x70d   :  { %v4151_v28 = vpop.f32.mrf.mxu0  ;;  %4155 = vmatmul.mubr.msk.f32.vlgmr.msra.gmra.mxu1 %vm400_vm4, %v4889_v26  ;;  %4162 = vmatprep.subr.mxu1 %v4628_v0 }
 0x70e   :  { %4170 = vmatprep.mubr.msk.f32.mxu1 %vm4629_vm1, %v4628_v0  ;;  %4163 = vmatpush3.msra.mxu1 %v4912_v46  ;;  %v5007_v28 = vld [vmem:[%s5607_s11 + $0x80] sm:$0xff] }
 0x70f   :  { %v1019_v29 = vpop.f32.mrf.mxu0  ;;  %4164 = vmatprep.subr.mxu1 %v4628_v0 }
 0x710   :  { %4165 = vmatpush3.msra.mxu1 %v4922_v48 }
 0x711   :  { %v4161_v30 = vpop.f32.mrf.mxu0  ;;  %4166 = vmatprep.subr.mxu1 %v4628_v0 }
 0x712   :  { %4167 = vmatpush3.msra.mxu1 %v4936_v50  ;;  %v5021_v30 = vld [vmem:[%s5607_s11 + $0x70] sm:$0xff] }
 0x713   :  { %4168 = vmatprep.subr.mxu1 %v4628_v0 }
 0x714   :  { %4169 = vmatpush3.msra.mxu1 %v4950_v52 }
 0x715   :  { %4184 = vmatprep.subr.mxu1 %v4628_v0 }
 0x7cd   :  { %v941_v31 = vpop.f32.mrf.mxu1 }
 0x7ce   :  { %v1020_v33 = vadd.f32 %v1019_v29, %v941_v31  ;;  %v5014_v29 = vld [vmem:[%s5607_s11 + $0x78] sm:$0xff] }
 0x7cf   :  { %v4156_v34 = vpop.f32.mrf.mxu1 }
 0x7d0   :  { %v4900_v35 = vadd.f32 %v3843_v32, %v1020_v33 }
 0x7d2   :  { %4487 = vtanh.f32 %v4900_v35  ;;  %v3844_v37 = vmul.f32 -1.442695, %v4900_v35 }
 0x7d4   :  { %4489 = vpow2.f32 %v3844_v37 }
 0x7df   :  { %v4488_v36 = vpop.eup %4487 }
 0x7e0   :  { %1040 = vrot.lane.b32.xlu0 %v4488_v36, %s4630_s28 }
 0x7e1   :  { %v4490_v38 = vpop.eup %4489 }
 0x7e2   :  { %v1034_v39 = vadd.f32 1.0, %v4490_v38 }
 0x7e4   :  { %4491 = vrcp.f32 %v1034_v39 }
 0x7f1   :  { %v4492_v40 = vpop.eup %4491 }
 0x7f2   :  { %v1038_v43 = vmul.f32 0.0, %v4492_v40 }
 0x852   :  { %v1041_v41 = vpop.permute.xlu0 %1040 }
 0x853   :  { %v1043_v42 = vmul.f32 %v4492_v40, %v1041_v41 }
 0x855   :  { %1045 = vrot.lane.b32.xlu1 %v1043_v42, %s4631_s12 }
 0x8c7   :  { %v1046_v44 = vpop.permute.xlu1 %1045 }
 0x8c8   :  { %v4906_v45 = vadd.f32 %v1046_v44, %v1038_v43 }
 0x8ca   :  { %4493 = vtanh.f32 %v4906_v45 }
 0x8d7   :  { %v4494_v54 = vpop.eup %4493 }
 0x8d8   :  { %1051 = vrot.lane.b32.xlu1 %v4494_v54, %s4630_s28 }
 0x94a   :  { %v1052_v55 = vpop.permute.xlu1 %1051 }
 0x94b   :  { %v1054_v56 = vmul.f32 %v4492_v40, %v1052_v55 }
 0x94d   :  { %1062 = vrot.lane.b32.xlu1 %v1054_v56, %s4631_s12 }
 0x9bf   :  { %v1063_v57 = vpop.permute.xlu1 %1062 }
 0x9c0   :  { %4171 = vmatmul.mubr.msk.f32.vlgmr.msra.gmra.mxu1 %vm1064_vm2, %v1063_v57  ;;  %4182 = vmatmul.mubr.msk.f32.vlgmr.msra.gmra.mxu0 %vm1064_vm2, %v1063_v57 }
 0x9c1   :  { %4196 = vmatpush3.msra.mxu0 %v4912_v46  ;;  %4203 = vmatprep.mubr.msk.f32.mxu0 %vm4629_vm1, %v4628_v0 }
 0x9c2   :  { %4197 = vmatprep.subr.mxu0 %v4628_v0  ;;  %4192 = vmatprep.mubr.msk.f32.mxu1 %vm4629_vm1, %v4628_v0 }
 0x9c3   :  { %4198 = vmatpush3.msra.mxu0 %v4922_v48  ;;  %4185 = vmatpush3.msra.mxu1 %v5002_v27 }
 0x9c4   :  { %4199 = vmatprep.subr.mxu0 %v4628_v0  ;;  %4186 = vmatprep.subr.mxu1 %v4628_v0 }
 0x9c5   :  { %4200 = vmatpush3.msra.mxu0 %v4936_v50  ;;  %4187 = vmatpush3.msra.mxu1 %v5007_v28 }
 0x9c6   :  { %4201 = vmatprep.subr.mxu0 %v4628_v0  ;;  %4188 = vmatprep.subr.mxu1 %v4628_v0 }
 0x9c7   :  { %4202 = vmatpush3.msra.mxu0 %v4950_v52  ;;  %4189 = vmatpush3.msra.mxu1 %v5014_v29 }
 0x9c8   :  { %4217 = vmatprep.subr.mxu0 %v4628_v0  ;;  %4190 = vmatprep.subr.mxu1 %v4628_v0 }
 0x9c9   :  { %4191 = vmatpush3.msra.mxu1 %v5021_v30 }
 0x9ca   :  { %4206 = vmatprep.subr.mxu1 %v4628_v0 }
 0xa80   :  { %v1133_v59 = vpop.f32.mrf.mxu1  ;;  %v1227_v60 = vpop.f32.mrf.mxu0 }
 0xa81   :  { %v1134_v61 = vadd.f32 %v4984_v58, %v1133_v59  ;;  %v1231_v62 = vadd.f32 %v1227_v60, %v4900_v35 }
 0xa82   :  { %v4172_v63 = vpop.f32.mrf.mxu1  ;;  %v4183_v1 = vpop.f32.mrf.mxu0 }
 0xa83   :  { %4495 = vtanh.f32 %v1134_v61  ;;  %v3847_v4 = vmul.f32 -1.442695, %v1134_v61  ;;  %v3849_v5 = vmul.f32 -1.442695, %v1231_v62 }
 0xa84   :  { %4497 = vtanh.f32 %v1231_v62 }
 0xa85   :  { %4499 = vpow2.f32 %v3847_v4 }
 0xa86   :  { %4501 = vpow2.f32 %v3849_v5 }
 0xa90   :  { %v4496_v2 = vpop.eup %4495 }
 0xa91   :  { %v4498_v3 = vpop.eup %4497  ;;  %1146 = vrot.lane.b32.xlu0 %v4496_v2, %s4630_s28 }
 0xa92   :  { %1241 = vrot.lane.b32.xlu1 %v4498_v3, %s4630_s28  ;;  %v4500_v6 = vpop.eup %4499 }
 0xa93   :  { %v4502_v7 = vpop.eup %4501  ;;  %v1140_v8 = vadd.f32 1.0, %v4500_v6 }
 0xa94   :  { %v1235_v9 = vadd.f32 1.0, %v4502_v7 }
 0xa95   :  { %4503 = vrcp.f32 %v1140_v8 }
 0xa96   :  { %4505 = vrcp.f32 %v1235_v9 }
 0xaa2   :  { %v4504_v10 = vpop.eup %4503 }
 0xaa3   :  { %v4506_v12 = vpop.eup %4505  ;;  %v1144_v17 = vmul.f32 0.0, %v4504_v10 }
 0xaa4   :  { %v1239_v18 = vmul.f32 %v4506_v12, %v4906_v45 }
 0xb03   :  { %v1147_v11 = vpop.permute.xlu0 %1146 }
 0xb04   :  { %v1242_v14 = vpop.permute.xlu1 %1241  ;;  %v1149_v15 = vmul.f32 %v4504_v10, %v1147_v11 }
 0xb05   :  { %v1244_v16 = vmul.f32 %v4506_v12, %v1242_v14 }
 0xb06   :  { %1151 = vrot.lane.b32.xlu0 %v1149_v15, %s4631_s12 }
 0xb07   :  { %1246 = vrot.lane.b32.xlu1 %v1244_v16, %s4631_s12 }
 0xb78   :  { %v1152_v19 = vpop.permute.xlu0 %1151 }
 0xb79   :  { %v1247_v21 = vpop.permute.xlu1 %1246  ;;  %v4993_v23 = vadd.f32 %v1152_v19, %v1144_v17 }
 0xb7a   :  { %v4995_v25 = vadd.f32 %v1247_v21, %v1239_v18 }
 0xb7b   :  { %4507 = vtanh.f32 %v4993_v23 }
 0xb7c   :  { %4509 = vtanh.f32 %v4995_v25 }
 0xb88   :  { %v4508_v31 = vpop.eup %4507 }
 0xb89   :  { %v4510_v32 = vpop.eup %4509  ;;  %1157 = vrot.lane.b32.xlu0 %v4508_v31, %s4630_s28 }
 0xb8a   :  { %1252 = vrot.lane.b32.xlu1 %v4510_v32, %s4630_s28 }
 0xbfb   :  { %v1158_v33 = vpop.permute.xlu0 %1157 }
 0xbfc   :  { %v1253_v34 = vpop.permute.xlu1 %1252  ;;  %v1160_v36 = vmul.f32 %v4504_v10, %v1158_v33 }
 0xbfd   :  { %v1255_v37 = vmul.f32 %v4506_v12, %v1253_v34 }
 0xbfe   :  { %1257 = vrot.lane.b32.xlu0 %v1160_v36, %s4631_s12 }
 0xbff   :  { %1332 = vrot.lane.b32.xlu1 %v1255_v37, %s4631_s12 }
 0xc70   :  { %v5031_v38 = vpop.permute.xlu0 %1257 }
 0xc71   :  { %v1333_v39 = vpop.permute.xlu1 %1332  ;;  %4193 = vmatmul.mubr.msk.f32.vlgmr.msra.gmra.mxu1 %vm1064_vm2, %v5031_v38 }
 0xc72   :  { %4204 = vmatmul.mubr.msk.f32.vlgmr.msra.gmra.mxu0 %vm1064_vm2, %v1333_v39  ;;  %4207 = vmatpush3.msra.mxu1 %v4917_v47 }
 0xc73   :  { %4208 = vmatprep.subr.mxu1 %v4628_v0  ;;  %4214 = vmatprep.mubr.msk.f32.mxu1 %vm4629_vm1, %v4628_v0 }
 0xc74   :  { %4209 = vmatpush3.msra.mxu1 %v4929_v49  ;;  %4218 = vmatpush3.msra.mxu0 %v5002_v27 }
 0xc75   :  { %4210 = vmatprep.subr.mxu1 %v4628_v0  ;;  %4219 = vmatprep.subr.mxu0 %v4628_v0 }
 0xc76   :  { %4211 = vmatpush3.msra.mxu1 %v4941_v51  ;;  %4220 = vmatpush3.msra.mxu0 %v5007_v28 }
 0xc77   :  { %4212 = vmatprep.subr.mxu1 %v4628_v0  ;;  %4221 = vmatprep.subr.mxu0 %v4628_v0 }
 0xc78   :  { %4213 = vmatpush3.msra.mxu1 %v4955_v53  ;;  %4222 = vmatpush3.msra.mxu0 %v5014_v29 }
 0xc79   :  { %4215 = vmatmul.mubr.msk.f32.vlgmr.msra.gmra.mxu1 %vm1064_vm2, %v1333_v39  ;;  %4223 = vmatprep.subr.mxu0 %v4628_v0 }
 0xc7a   :  { %4228 = vmatprep.subr.mxu1 %v4628_v0  ;;  %4224 = vmatpush3.msra.mxu0 %v5021_v30 }
 0xc7b   :  { %4229 = vmatpush3.msra.mxu1 %v4912_v46  ;;  %4225 = vmatprep.mubr.msk.f32.mxu0 %vm4629_vm1, %v4628_v0 }
 0xc7c   :  { %4230 = vmatprep.subr.mxu1 %v4628_v0  ;;  %4239 = vmatprep.subr.mxu0 %v4628_v0 }
 0xc7d   :  { %4231 = vmatpush3.msra.mxu1 %v4922_v48  ;;  %4236 = vmatprep.mubr.msk.f32.mxu1 %vm4629_vm1, %v4628_v0 }
 0xc7e   :  { %4232 = vmatprep.subr.mxu1 %v4628_v0 }
 0xc7f   :  { %4233 = vmatpush3.msra.mxu1 %v4936_v50 }
 0xc80   :  { %4234 = vmatprep.subr.mxu1 %v4628_v0 }
 0xc81   :  { %4235 = vmatpush3.msra.mxu1 %v4950_v52 }
 0xc82   :  { %4250 = vmatprep.subr.mxu1 %v4628_v0 }
 0xd31   :  { %v1327_v40 = vpop.f32.mrf.mxu1 }
 0xd32   :  { %v1402_v41 = vpop.f32.mrf.mxu0 }
 0xd33   :  { %v1403_v42 = vadd.f32 %v1402_v41, %v1327_v40  ;;  %v4194_v43 = vpop.f32.mrf.mxu1 }
 0xd34   :  { %v4205_v44 = vpop.f32.mrf.mxu0 }
 0xd35   :  { %v1406_v45 = vadd.f32 %v4984_v58, %v1403_v42 }
 0xd37   :  { %4511 = vtanh.f32 %v1406_v45  ;;  %v3852_v60 = vmul.f32 -1.442695, %v1406_v45 }
 0xd39   :  { %v1497_v54 = vpop.f32.mrf.mxu1 }
 0xd3a   :  { %v1501_v55 = vadd.f32 %v1497_v54, %v4900_v35 }
 0xd3b   :  { %v4216_v56 = vpop.f32.mrf.mxu1 }
 0xd3c   :  { %4513 = vtanh.f32 %v1501_v55  ;;  %v3854_v61 = vmul.f32 -1.442695, %v1501_v55 }
 0xd3d   :  { %4515 = vpow2.f32 %v3852_v60 }
 0xd3e   :  { %4517 = vpow2.f32 %v3854_v61 }
 0xd44   :  { %v4512_v57 = vpop.eup %4511 }
 0xd45   :  { %1416 = vrot.lane.b32.xlu0 %v4512_v57, %s4630_s28 }
 0xd49   :  { %v4514_v59 = vpop.eup %4513 }
 0xd4a   :  { %1511 = vrot.lane.b32.xlu1 %v4514_v59, %s4630_s28  ;;  %v4516_v62 = vpop.eup %4515 }
 0xd4b   :  { %v1410_v63 = vadd.f32 1.0, %v4516_v62  ;;  %v4518_v1 = vpop.eup %4517 }
 0xd4c   :  { %v1505_v2 = vadd.f32 1.0, %v4518_v1 }
 0xd4d   :  { %4519 = vrcp.f32 %v1410_v63 }
 0xd4e   :  { %4521 = vrcp.f32 %v1505_v2 }
 0xd5a   :  { %v4520_v3 = vpop.eup %4519 }
 0xd5b   :  { %v4522_v6 = vpop.eup %4521  ;;  %v1414_v9 = vmul.f32 %v4520_v3, %v4993_v23 }
 0xd5c   :  { %v1509_v12 = vmul.f32 %v4522_v6, %v4995_v25 }
 0xdb7   :  { %v1417_v4 = vpop.permute.xlu0 %1416 }
 0xdb8   :  { %v1419_v5 = vmul.f32 %v4520_v3, %v1417_v4 }
 0xdba   :  { %1421 = vrot.lane.b32.xlu0 %v1419_v5, %s4631_s12 }
 0xdbc   :  { %v1512_v7 = vpop.permute.xlu1 %1511 }
 0xdbd   :  { %v1514_v8 = vmul.f32 %v4522_v6, %v1512_v7 }
 0xdbf   :  { %1516 = vrot.lane.b32.xlu1 %v1514_v8, %s4631_s12 }
 0xe2c   :  { %v1422_v10 = vpop.permute.xlu0 %1421 }
 0xe2d   :  { %v5074_v11 = vadd.f32 %v1422_v10, %v1414_v9 }
 0xe2f   :  { %4523 = vtanh.f32 %v5074_v11 }
 0xe31   :  { %v1517_v14 = vpop.permute.xlu1 %1516 }
 0xe32   :  { %v5078_v15 = vadd.f32 %v1517_v14, %v1509_v12 }
 0xe34   :  { %4525 = vtanh.f32 %v5078_v15 }
 0xe3c   :  { %v4524_v16 = vpop.eup %4523 }
 0xe3d   :  { %1427 = vrot.lane.b32.xlu0 %v4524_v16, %s4630_s28 }
 0xe41   :  { %v4526_v17 = vpop.eup %4525 }
 0xe42   :  { %1522 = vrot.lane.b32.xlu1 %v4526_v17, %s4630_s28 }
 0xeaf   :  { %v1428_v18 = vpop.permute.xlu0 %1427 }
 0xeb0   :  { %v5083_v19 = vmul.f32 %v4520_v3, %v1428_v18 }
 0xeb2   :  { %1527 = vrot.lane.b32.xlu0 %v5083_v19, %s4631_s12 }
 0xeb4   :  { %v1523_v21 = vpop.permute.xlu1 %1522 }
 0xeb5   :  { %v1525_v23 = vmul.f32 %v4522_v6, %v1523_v21 }
 0xeb7   :  { %1602 = vrot.lane.b32.xlu1 %v1525_v23, %s4631_s12 }
 0xf24   :  { %v1528_v25 = vpop.permute.xlu0 %1527 }
 0xf25   :  { %4226 = vmatmul.mubr.msk.f32.vlgmr.msra.gmra.mxu0 %vm1064_vm2, %v1528_v25 }
 0xf26   :  { %4240 = vmatpush3.msra.mxu0 %v4917_v47  ;;  %4247 = vmatprep.mubr.msk.f32.mxu0 %vm4629_vm1, %v4628_v0 }
 0xf27   :  { %4241 = vmatprep.subr.mxu0 %v4628_v0 }
 0xf28   :  { %4242 = vmatpush3.msra.mxu0 %v4929_v49 }
 0xf29   :  { %4243 = vmatprep.subr.mxu0 %v4628_v0  ;;  %v1603_v31 = vpop.permute.xlu1 %1602 }
 0xf2a   :  { %4244 = vmatpush3.msra.mxu0 %v4941_v51  ;;  %4237 = vmatmul.mubr.msk.f32.vlgmr.msra.gmra.mxu1 %vm1064_vm2, %v1603_v31 }
 0xf2b   :  { %4245 = vmatprep.subr.mxu0 %v4628_v0  ;;  %4251 = vmatpush3.msra.mxu1 %v5002_v27 }
 0xf2c   :  { %4246 = vmatpush3.msra.mxu0 %v4955_v53  ;;  %4252 = vmatprep.subr.mxu1 %v4628_v0 }
 0xf2d   :  { %4248 = vmatmul.mubr.msk.f32.vlgmr.msra.gmra.mxu0 %vm1064_vm2, %v1603_v31  ;;  %4261 = vmatprep.subr.mxu0 %v4628_v0 }
 0xf2e   :  { %4262 = vmatpush3.msra.mxu0 %v4912_v46  ;;  %4253 = vmatpush3.msra.mxu1 %v5007_v28 }
 0xf2f   :  { %4263 = vmatprep.subr.mxu0 %v4628_v0  ;;  %4254 = vmatprep.subr.mxu1 %v4628_v0 }
 0xf30   :  { %4264 = vmatpush3.msra.mxu0 %v4922_v48  ;;  %4255 = vmatpush3.msra.mxu1 %v5014_v29 }
 0xf31   :  { %4265 = vmatprep.subr.mxu0 %v4628_v0  ;;  %4256 = vmatprep.subr.mxu1 %v4628_v0 }
 0xf32   :  { %4266 = vmatpush3.msra.mxu0 %v4936_v50  ;;  %4257 = vmatpush3.msra.mxu1 %v5021_v30 }
 0xf33   :  { %4267 = vmatprep.subr.mxu0 %v4628_v0  ;;  %4269 = vmatprep.mubr.msk.f32.mxu0 %vm4629_vm1, %v4628_v0 }
 0xf34   :  { %4268 = vmatpush3.msra.mxu0 %v4950_v52  ;;  %4258 = vmatprep.mubr.msk.f32.mxu1 %vm4629_vm1, %v4628_v0 }
 0xf35   :  { %4272 = vmatprep.subr.mxu1 %v4628_v0  ;;  %4283 = vmatprep.subr.mxu0 %v4628_v0 }
 0xfe5   :  { %v1597_v32 = vpop.f32.mrf.mxu0 }
 0xfe7   :  { %v4227_v33 = vpop.f32.mrf.mxu0 }
 0xfea   :  { %v1672_v34 = vpop.f32.mrf.mxu1 }
 0xfeb   :  { %v1673_v36 = vadd.f32 %v1672_v34, %v1597_v32 }
 0xfec   :  { %v4238_v37 = vpop.f32.mrf.mxu1 }
 0xfed   :  { %v1676_v39 = vadd.f32 %v4984_v58, %v1673_v36  ;;  %v1767_v40 = vpop.f32.mrf.mxu0 }
 0xfee   :  { %v1771_v41 = vadd.f32 %v1767_v40, %v4900_v35 }
 0xfef   :  { %4527 = vtanh.f32 %v1676_v39  ;;  %v4249_v42 = vpop.f32.mrf.mxu0  ;;  %v3857_v45 = vmul.f32 -1.442695, %v1676_v39 }
 0xff0   :  { %4529 = vtanh.f32 %v1771_v41  ;;  %v3859_v54 = vmul.f32 -1.442695, %v1771_v41 }
 0xff1   :  { %4531 = vpow2.f32 %v3857_v45 }
 0xff2   :  { %4533 = vpow2.f32 %v3859_v54 }
 0xffc   :  { %v4528_v43 = vpop.eup %4527 }
 0xffd   :  { %v4530_v44 = vpop.eup %4529  ;;  %1686 = vrot.lane.b32.xlu0 %v4528_v43, %s4630_s28 }
 0xffe   :  { %1781 = vrot.lane.b32.xlu1 %v4530_v44, %s4630_s28  ;;  %v4532_v55 = vpop.eup %4531 }
 0xfff   :  { %v4534_v56 = vpop.eup %4533  ;;  %v1680_v57 = vadd.f32 1.0, %v4532_v55 }
0x1000   :  { %v1775_v59 = vadd.f32 1.0, %v4534_v56 }
0x1001   :  { %4535 = vrcp.f32 %v1680_v57 }
0x1002   :  { %4537 = vrcp.f32 %v1775_v59 }
0x100e   :  { %v4536_v60 = vpop.eup %4535 }
0x100f   :  { %v4538_v62 = vpop.eup %4537  ;;  %v1684_v3 = vmul.f32 %v4536_v60, %v5074_v11 }
0x1010   :  { %v1779_v4 = vmul.f32 %v4538_v62, %v5078_v15 }
0x106f   :  { %v1687_v61 = vpop.permute.xlu0 %1686 }
0x1070   :  { %v1782_v63 = vpop.permute.xlu1 %1781  ;;  %v1689_v1 = vmul.f32 %v4536_v60, %v1687_v61 }
0x1071   :  { %v1784_v2 = vmul.f32 %v4538_v62, %v1782_v63 }
0x1072   :  { %1691 = vrot.lane.b32.xlu0 %v1689_v1, %s4631_s12 }
0x1073   :  { %1786 = vrot.lane.b32.xlu1 %v1784_v2, %s4631_s12 }
0x10e4   :  { %v1692_v5 = vpop.permute.xlu0 %1691 }
0x10e5   :  { %v1787_v6 = vpop.permute.xlu1 %1786  ;;  %v5129_v7 = vadd.f32 %v1692_v5, %v1684_v3 }
0x10e6   :  { %v5131_v8 = vadd.f32 %v1787_v6, %v1779_v4 }
0x10e7   :  { %4539 = vtanh.f32 %v5129_v7 }
0x10e8   :  { %4541 = vtanh.f32 %v5131_v8 }
0x10f4   :  { %v4540_v9 = vpop.eup %4539 }
0x10f5   :  { %v4542_v10 = vpop.eup %4541  ;;  %1697 = vrot.lane.b32.xlu0 %v4540_v9, %s4630_s28 }
0x10f6   :  { %1792 = vrot.lane.b32.xlu1 %v4542_v10, %s4630_s28 }
0x1167   :  { %v1698_v12 = vpop.permute.xlu0 %1697 }
0x1168   :  { %v1793_v11 = vpop.permute.xlu1 %1792  ;;  %v5137_v14 = vmul.f32 %v4536_v60, %v1698_v12 }
0x1169   :  { %v1795_v15 = vmul.f32 %v4538_v62, %v1793_v11 }
0x116a   :  { %1797 = vrot.lane.b32.xlu0 %v5137_v14, %s4631_s12 }
0x116b   :  { %1872 = vrot.lane.b32.xlu1 %v1795_v15, %s4631_s12 }
0x11dc   :  { %v1798_v16 = vpop.permute.xlu0 %1797 }
0x11dd   :  { %v1873_v17 = vpop.permute.xlu1 %1872  ;;  %4259 = vmatmul.mubr.msk.f32.vlgmr.msra.gmra.mxu1 %vm1064_vm2, %v1798_v16 }
0x11de   :  { %4270 = vmatmul.mubr.msk.f32.vlgmr.msra.gmra.mxu0 %vm1064_vm2, %v1873_v17  ;;  %4273 = vmatpush3.msra.mxu1 %v4917_v47 }
0x11df   :  { %4274 = vmatprep.subr.mxu1 %v4628_v0  ;;  %4280 = vmatprep.mubr.msk.f32.mxu1 %vm4629_vm1, %v4628_v0 }
0x11e0   :  { %4275 = vmatpush3.msra.mxu1 %v4929_v49  ;;  %4284 = vmatpush3.msra.mxu0 %v5002_v27 }
0x11e1   :  { %4276 = vmatprep.subr.mxu1 %v4628_v0  ;;  %4285 = vmatprep.subr.mxu0 %v4628_v0 }
0x11e2   :  { %4277 = vmatpush3.msra.mxu1 %v4941_v51  ;;  %4286 = vmatpush3.msra.mxu0 %v5007_v28 }
0x11e3   :  { %4278 = vmatprep.subr.mxu1 %v4628_v0  ;;  %4287 = vmatprep.subr.mxu0 %v4628_v0 }
0x11e4   :  { %4279 = vmatpush3.msra.mxu1 %v4955_v53  ;;  %4288 = vmatpush3.msra.mxu0 %v5014_v29 }
0x11e5   :  { %4281 = vmatmul.mubr.msk.f32.vlgmr.msra.gmra.mxu1 %vm1064_vm2, %v1873_v17  ;;  %4289 = vmatprep.subr.mxu0 %v4628_v0 }
0x11e6   :  { %4294 = vmatprep.subr.mxu1 %v4628_v0  ;;  %4290 = vmatpush3.msra.mxu0 %v5021_v30 }
0x11e7   :  { %4295 = vmatpush3.msra.mxu1 %v4912_v46  ;;  %4291 = vmatprep.mubr.msk.f32.mxu0 %vm4629_vm1, %v4628_v0 }
0x11e8   :  { %4296 = vmatprep.subr.mxu1 %v4628_v0  ;;  %4305 = vmatprep.subr.mxu0 %v4628_v0 }
0x11e9   :  { %4297 = vmatpush3.msra.mxu1 %v4922_v48  ;;  %4302 = vmatprep.mubr.msk.f32.mxu1 %vm4629_vm1, %v4628_v0 }
0x11ea   :  { %4298 = vmatprep.subr.mxu1 %v4628_v0 }
0x11eb   :  { %4299 = vmatpush3.msra.mxu1 %v4936_v50 }
0x11ec   :  { %4300 = vmatprep.subr.mxu1 %v4628_v0 }
0x11ed   :  { %4301 = vmatpush3.msra.mxu1 %v4950_v52 }
0x11ee   :  { %4316 = vmatprep.subr.mxu1 %v4628_v0 }
0x129d   :  { %v1867_v18 = vpop.f32.mrf.mxu1 }
0x129e   :  { %v1942_v21 = vpop.f32.mrf.mxu0 }
0x129f   :  { %v1943_v23 = vadd.f32 %v1942_v21, %v1867_v18  ;;  %v4260_v25 = vpop.f32.mrf.mxu1 }
0x12a0   :  { %v4271_v31 = vpop.f32.mrf.mxu0 }
0x12a1   :  { %v1946_v32 = vadd.f32 %v4984_v58, %v1943_v23 }
0x12a3   :  { %4543 = vtanh.f32 %v1946_v32  ;;  %v3862_v40 = vmul.f32 -1.442695, %v1946_v32 }
0x12a5   :  { %v2037_v33 = vpop.f32.mrf.mxu1 }
0x12a6   :  { %v2041_v34 = vadd.f32 %v2037_v33, %v4900_v35 }
0x12a7   :  { %v4282_v36 = vpop.f32.mrf.mxu1 }
0x12a8   :  { %4545 = vtanh.f32 %v2041_v34  ;;  %v3864_v41 = vmul.f32 -1.442695, %v2041_v34 }
0x12a9   :  { %4547 = vpow2.f32 %v3862_v40 }
0x12aa   :  { %4549 = vpow2.f32 %v3864_v41 }
0x12b0   :  { %v4544_v37 = vpop.eup %4543 }
0x12b1   :  { %1956 = vrot.lane.b32.xlu0 %v4544_v37, %s4630_s28 }
0x12b5   :  { %v4546_v39 = vpop.eup %4545 }
0x12b6   :  { %2051 = vrot.lane.b32.xlu1 %v4546_v39, %s4630_s28  ;;  %v4548_v42 = vpop.eup %4547 }
0x12b7   :  { %v1950_v43 = vadd.f32 1.0, %v4548_v42  ;;  %v4550_v44 = vpop.eup %4549 }
0x12b8   :  { %v2045_v45 = vadd.f32 1.0, %v4550_v44 }
0x12b9   :  { %4551 = vrcp.f32 %v1950_v43 }
0x12ba   :  { %4553 = vrcp.f32 %v2045_v45 }
0x12c6   :  { %v4552_v54 = vpop.eup %4551 }
0x12c7   :  { %v4554_v57 = vpop.eup %4553  ;;  %v1954_v61 = vmul.f32 %v4552_v54, %v5129_v7 }
0x12c8   :  { %v2049_v1 = vmul.f32 %v4554_v57, %v5131_v8 }
0x1323   :  { %v1957_v55 = vpop.permute.xlu0 %1956 }
0x1324   :  { %v1959_v56 = vmul.f32 %v4552_v54, %v1957_v55 }
0x1326   :  { %1961 = vrot.lane.b32.xlu0 %v1959_v56, %s4631_s12 }
0x1328   :  { %v2052_v59 = vpop.permute.xlu1 %2051 }
0x1329   :  { %v2054_v60 = vmul.f32 %v4554_v57, %v2052_v59 }
0x132b   :  { %2056 = vrot.lane.b32.xlu1 %v2054_v60, %s4631_s12 }
0x1398   :  { %v1962_v62 = vpop.permute.xlu0 %1961 }
0x1399   :  { %v5182_v63 = vadd.f32 %v1962_v62, %v1954_v61 }
0x139b   :  { %4555 = vtanh.f32 %v5182_v63 }
0x139d   :  { %v2057_v2 = vpop.permute.xlu1 %2056 }
0x139e   :  { %v5186_v3 = vadd.f32 %v2057_v2, %v2049_v1 }
0x13a0   :  { %4557 = vtanh.f32 %v5186_v3 }
0x13a8   :  { %v4556_v4 = vpop.eup %4555 }
0x13a9   :  { %1967 = vrot.lane.b32.xlu0 %v4556_v4, %s4630_s28 }
0x13ad   :  { %v4558_v5 = vpop.eup %4557 }
0x13ae   :  { %2062 = vrot.lane.b32.xlu1 %v4558_v5, %s4630_s28 }
0x141b   :  { %v1968_v6 = vpop.permute.xlu0 %1967 }
0x141c   :  { %v5191_v7 = vmul.f32 %v4552_v54, %v1968_v6 }
0x141e   :  { %2067 = vrot.lane.b32.xlu0 %v5191_v7, %s4631_s12 }
0x1420   :  { %v2063_v9 = vpop.permute.xlu1 %2062 }
0x1421   :  { %v2065_v10 = vmul.f32 %v4554_v57, %v2063_v9 }
0x1423   :  { %2142 = vrot.lane.b32.xlu1 %v2065_v10, %s4631_s12 }
0x1490   :  { %v2068_v8 = vpop.permute.xlu0 %2067 }
0x1491   :  { %4292 = vmatmul.mubr.msk.f32.vlgmr.msra.gmra.mxu0 %vm1064_vm2, %v2068_v8 }
0x1492   :  { %4306 = vmatpush3.msra.mxu0 %v4917_v47  ;;  %4313 = vmatprep.mubr.msk.f32.mxu0 %vm4629_vm1, %v4628_v0 }
0x1493   :  { %4307 = vmatprep.subr.mxu0 %v4628_v0 }
0x1494   :  { %4308 = vmatpush3.msra.mxu0 %v4929_v49 }
0x1495   :  { %4309 = vmatprep.subr.mxu0 %v4628_v0  ;;  %v2143_v12 = vpop.permute.xlu1 %2142 }
0x1496   :  { %4310 = vmatpush3.msra.mxu0 %v4941_v51  ;;  %4303 = vmatmul.mubr.msk.f32.vlgmr.msra.gmra.mxu1 %vm1064_vm2, %v2143_v12 }
0x1497   :  { %4311 = vmatprep.subr.mxu0 %v4628_v0  ;;  %4317 = vmatpush3.msra.mxu1 %v5002_v27 }
0x1498   :  { %4312 = vmatpush3.msra.mxu0 %v4955_v53  ;;  %4318 = vmatprep.subr.mxu1 %v4628_v0 }
0x1499   :  { %4314 = vmatmul.mubr.msk.f32.vlgmr.msra.gmra.mxu0 %vm1064_vm2, %v2143_v12  ;;  %4327 = vmatprep.subr.mxu0 %v4628_v0 }
0x149a   :  { %4328 = vmatpush3.msra.mxu0 %v4912_v46  ;;  %4319 = vmatpush3.msra.mxu1 %v5007_v28 }
0x149b   :  { %4329 = vmatprep.subr.mxu0 %v4628_v0  ;;  %4320 = vmatprep.subr.mxu1 %v4628_v0 }
0x149c   :  { %4330 = vmatpush3.msra.mxu0 %v4922_v48  ;;  %4321 = vmatpush3.msra.mxu1 %v5014_v29 }
0x149d   :  { %4331 = vmatprep.subr.mxu0 %v4628_v0  ;;  %4322 = vmatprep.subr.mxu1 %v4628_v0 }
0x149e   :  { %4332 = vmatpush3.msra.mxu0 %v4936_v50  ;;  %4323 = vmatpush3.msra.mxu1 %v5021_v30 }
0x149f   :  { %4333 = vmatprep.subr.mxu0 %v4628_v0  ;;  %4335 = vmatprep.mubr.msk.f32.mxu0 %vm4629_vm1, %v4628_v0 }
0x14a0   :  { %4334 = vmatpush3.msra.mxu0 %v4950_v52  ;;  %4324 = vmatprep.mubr.msk.f32.mxu1 %vm4629_vm1, %v4628_v0 }
0x14a1   :  { %4338 = vmatprep.subr.mxu1 %v4628_v0  ;;  %4349 = vmatprep.subr.mxu0 %v4628_v0 }
0x1551   :  { %v2137_v11 = vpop.f32.mrf.mxu0 }
0x1553   :  { %v4293_v15 = vpop.f32.mrf.mxu0 }
0x1556   :  { %v2212_v16 = vpop.f32.mrf.mxu1 }
0x1557   :  { %v2213_v17 = vadd.f32 %v2212_v16, %v2137_v11 }
0x1558   :  { %v4304_v18 = vpop.f32.mrf.mxu1 }
0x1559   :  { %v2216_v21 = vadd.f32 %v4984_v58, %v2213_v17  ;;  %v2307_v23 = vpop.f32.mrf.mxu0 }
0x155a   :  { %v2311_v25 = vadd.f32 %v2307_v23, %v4900_v35 }
0x155b   :  { %4559 = vtanh.f32 %v2216_v21  ;;  %v4315_v31 = vpop.f32.mrf.mxu0  ;;  %v3867_v34 = vmul.f32 -1.442695, %v2216_v21 }
0x155c   :  { %4561 = vtanh.f32 %v2311_v25  ;;  %v3869_v36 = vmul.f32 -1.442695, %v2311_v25 }
0x155d   :  { %4563 = vpow2.f32 %v3867_v34 }
0x155e   :  { %4565 = vpow2.f32 %v3869_v36 }
0x1568   :  { %v4560_v32 = vpop.eup %4559 }
0x1569   :  { %v4562_v33 = vpop.eup %4561  ;;  %2226 = vrot.lane.b32.xlu0 %v4560_v32, %s4630_s28 }
0x156a   :  { %2321 = vrot.lane.b32.xlu1 %v4562_v33, %s4630_s28  ;;  %v4564_v37 = vpop.eup %4563 }
0x156b   :  { %v4566_v39 = vpop.eup %4565  ;;  %v2220_v40 = vadd.f32 1.0, %v4564_v37 }
0x156c   :  { %v2315_v41 = vadd.f32 1.0, %v4566_v39 }
0x156d   :  { %4567 = vrcp.f32 %v2220_v40 }
0x156e   :  { %4569 = vrcp.f32 %v2315_v41 }
0x157a   :  { %v4568_v42 = vpop.eup %4567 }
0x157b   :  { %v4570_v44 = vpop.eup %4569  ;;  %v2224_v56 = vmul.f32 %v4568_v42, %v5182_v63 }
0x157c   :  { %v2319_v57 = vmul.f32 %v4570_v44, %v5186_v3 }
0x15db   :  { %v2227_v43 = vpop.permute.xlu0 %2226 }
0x15dc   :  { %v2322_v45 = vpop.permute.xlu1 %2321  ;;  %v2229_v54 = vmul.f32 %v4568_v42, %v2227_v43 }
0x15dd   :  { %v2324_v55 = vmul.f32 %v4570_v44, %v2322_v45 }
0x15de   :  { %2231 = vrot.lane.b32.xlu0 %v2229_v54, %s4631_s12 }
0x15df   :  { %2326 = vrot.lane.b32.xlu1 %v2324_v55, %s4631_s12 }
0x1650   :  { %v2232_v59 = vpop.permute.xlu0 %2231 }
0x1651   :  { %v2327_v60 = vpop.permute.xlu1 %2326  ;;  %v5237_v61 = vadd.f32 %v2232_v59, %v2224_v56  ;;  %v4620_v59 = vld [vmem:[%s5607_s11 + $0x40] sm:$0xff] }
0x1652   :  { %v5239_v62 = vadd.f32 %v2327_v60, %v2319_v57  ;;  %v4619_v57 = vld [vmem:[%s5607_s11 + $0x48] sm:$0xff] }
0x1653   :  { %4571 = vtanh.f32 %v5237_v61 }
0x1654   :  { %4573 = vtanh.f32 %v5239_v62 }
0x1660   :  { %v4572_v1 = vpop.eup %4571 }
0x1661   :  { %v4574_v2 = vpop.eup %4573  ;;  %2237 = vrot.lane.b32.xlu0 %v4572_v1, %s4630_s28  ;;  %v4623_v1 = vld [vmem:[%s5607_s11 + $0x68] sm:$0xff] }
0x1662   :  { %2332 = vrot.lane.b32.xlu1 %v4574_v2, %s4630_s28  ;;  %v4625_v2 = vld [vmem:[%s5607_s11 + $0x58] sm:$0xff] }
0x16d3   :  { %v2238_v4 = vpop.permute.xlu0 %2237 }
0x16d4   :  { %v2333_v63 = vpop.permute.xlu1 %2332  ;;  %v2240_v5 = vmul.f32 %v4568_v42, %v2238_v4 }
0x16d5   :  { %v2335_v3 = vmul.f32 %v4570_v44, %v2333_v63 }
0x16d6   :  { %2337 = vrot.lane.b32.xlu0 %v2240_v5, %s4631_s12 }
0x16d7   :  { %2412 = vrot.lane.b32.xlu1 %v2335_v3, %s4631_s12 }
0x1748   :  { %v5247_v6 = vpop.permute.xlu0 %2337 }
0x1749   :  { %v2413_v9 = vpop.permute.xlu1 %2412  ;;  %4325 = vmatmul.mubr.msk.f32.vlgmr.msra.gmra.mxu1 %vm1064_vm2, %v5247_v6 }
0x174a   :  { %4336 = vmatmul.mubr.msk.f32.vlgmr.msra.gmra.mxu0 %vm1064_vm2, %v2413_v9  ;;  %4339 = vmatpush3.msra.mxu1 %v4917_v47 }
0x174b   :  { %4340 = vmatprep.subr.mxu1 %v4628_v0  ;;  %4346 = vmatprep.mubr.msk.f32.mxu1 %vm4629_vm1, %v4628_v0 }
0x174c   :  { %4341 = vmatpush3.msra.mxu1 %v4929_v49  ;;  %4350 = vmatpush3.msra.mxu0 %v5002_v27 }
0x174d   :  { %4342 = vmatprep.subr.mxu1 %v4628_v0  ;;  %4351 = vmatprep.subr.mxu0 %v4628_v0 }
0x174e   :  { %4343 = vmatpush3.msra.mxu1 %v4941_v51  ;;  %4352 = vmatpush3.msra.mxu0 %v5007_v28 }
0x174f   :  { %4344 = vmatprep.subr.mxu1 %v4628_v0  ;;  %4353 = vmatprep.subr.mxu0 %v4628_v0 }
0x1750   :  { %4345 = vmatpush3.msra.mxu1 %v4955_v53  ;;  %4354 = vmatpush3.msra.mxu0 %v5014_v29 }
0x1751   :  { %4347 = vmatmul.mubr.msk.f32.vlgmr.msra.gmra.mxu1 %vm1064_vm2, %v2413_v9  ;;  %4355 = vmatprep.subr.mxu0 %v4628_v0 }
0x1752   :  { %4360 = vmatprep.subr.mxu1 %v4628_v0  ;;  %4356 = vmatpush3.msra.mxu0 %v5021_v30 }
0x1753   :  { %4361 = vmatpush3.msra.mxu1 %v4912_v46  ;;  %4357 = vmatprep.mubr.msk.f32.mxu0 %vm4629_vm1, %v4628_v0 }
0x1754   :  { %4362 = vmatprep.subr.mxu1 %v4628_v0  ;;  %4371 = vmatprep.subr.mxu0 %v4628_v0 }
0x1755   :  { %4363 = vmatpush3.msra.mxu1 %v4922_v48  ;;  %4368 = vmatprep.mubr.msk.f32.mxu1 %vm4629_vm1, %v4628_v0 }
0x1756   :  { %4364 = vmatprep.subr.mxu1 %v4628_v0 }
0x1757   :  { %4365 = vmatpush3.msra.mxu1 %v4936_v50 }
0x1758   :  { %4366 = vmatprep.subr.mxu1 %v4628_v0 }
0x1759   :  { %4367 = vmatpush3.msra.mxu1 %v4950_v52 }
0x175a   :  { %4382 = vmatprep.subr.mxu1 %v4628_v0 }
0x1809   :  { %v2407_v46 = vpop.f32.mrf.mxu1 }
0x180a   :  { %v2482_v47 = vpop.f32.mrf.mxu0 }
0x180b   :  { %v2483_v49 = vadd.f32 %v2482_v47, %v2407_v46  ;;  %v4326_v51 = vpop.f32.mrf.mxu1 }
0x180c   :  { %v4337_v53 = vpop.f32.mrf.mxu0 }
0x180d   :  { %v2486_v48 = vadd.f32 %v4984_v58, %v2483_v49 }
0x180f   :  { %4575 = vtanh.f32 %v2486_v48  ;;  %v3872_v52 = vmul.f32 -1.442695, %v2486_v48 }
0x1811   :  { %v2577_v10 = vpop.f32.mrf.mxu1 }
0x1812   :  { %v2581_v8 = vadd.f32 %v2577_v10, %v4900_v35 }
0x1813   :  { %v4348_v12 = vpop.f32.mrf.mxu1 }
0x1814   :  { %4577 = vtanh.f32 %v2581_v8  ;;  %v3874_v15 = vmul.f32 -1.442695, %v2581_v8 }
0x1815   :  { %4579 = vpow2.f32 %v3872_v52 }
0x1816   :  { %4581 = vpow2.f32 %v3874_v15 }
0x181c   :  { %v4576_v50 = vpop.eup %4575 }
0x181d   :  { %2496 = vrot.lane.b32.xlu0 %v4576_v50, %s4630_s28 }
0x1821   :  { %v4578_v11 = vpop.eup %4577 }
0x1822   :  { %2591 = vrot.lane.b32.xlu1 %v4578_v11, %s4630_s28  ;;  %v4580_v16 = vpop.eup %4579 }
0x1823   :  { %v2490_v17 = vadd.f32 1.0, %v4580_v16  ;;  %v4582_v18 = vpop.eup %4581 }
0x1824   :  { %v2585_v58 = vadd.f32 1.0, %v4582_v18 }
0x1825   :  { %4583 = vrcp.f32 %v2490_v17 }
0x1826   :  { %4585 = vrcp.f32 %v2585_v58 }
0x1832   :  { %v4584_v21 = vpop.eup %4583 }
0x1833   :  { %v4586_v31 = vpop.eup %4585  ;;  %v2494_v34 = vmul.f32 %v4584_v21, %v5237_v61  ;;  %v4621_v61 = vld [vmem:[%s5607_s11 + $0x38] sm:$0xff] }
0x1834   :  { %v2589_v39 = vmul.f32 %v4586_v31, %v5239_v62  ;;  %v4622_v62 = vld [vmem:[%s5607_s11 + $0x30] sm:$0xff] }
0x188f   :  { %v2497_v23 = vpop.permute.xlu0 %2496 }
0x1890   :  { %v2499_v25 = vmul.f32 %v4584_v21, %v2497_v23 }
0x1892   :  { %2501 = vrot.lane.b32.xlu0 %v2499_v25, %s4631_s12 }
0x1894   :  { %v2592_v32 = vpop.permute.xlu1 %2591 }
0x1895   :  { %v2594_v33 = vmul.f32 %v4586_v31, %v2592_v32 }
0x1897   :  { %2596 = vrot.lane.b32.xlu1 %v2594_v33, %s4631_s12  ;;  %v3188_v33 = vld [vmem:[%s5612_s16 + $0x18] sm:$0xff] }
0x1904   :  { %v2502_v36 = vpop.permute.xlu0 %2501 }
0x1905   :  { %v5290_v37 = vadd.f32 %v2502_v36, %v2494_v34  ;;  %v3187_v36 = vld [vmem:[%s5612_s16 + $0x10] sm:$0xff] }
0x1907   :  { %4587 = vtanh.f32 %v5290_v37 }
0x1909   :  { %v2597_v40 = vpop.permute.xlu1 %2596 }
0x190a   :  { %v5294_v41 = vadd.f32 %v2597_v40, %v2589_v39  ;;  %v3186_v39 = vld [vmem:[%s5608_s1] sm:$0x3] }
0x190c   :  { %4589 = vtanh.f32 %v5294_v41 }
0x1914   :  { %v4588_v42 = vpop.eup %4587 }
0x1915   :  { %2507 = vrot.lane.b32.xlu0 %v4588_v42, %s4630_s28 }
0x1919   :  { %v4590_v43 = vpop.eup %4589 }
0x191a   :  { %2602 = vrot.lane.b32.xlu1 %v4590_v43, %s4630_s28 }
0x1987   :  { %v2508_v44 = vpop.permute.xlu0 %2507 }
0x1988   :  { %v5299_v45 = vmul.f32 %v4584_v21, %v2508_v44  ;;  %v3184_v44 = vld [vmem:[%s5612_s16] sm:$0xff] }
0x198a   :  { %2607 = vrot.lane.b32.xlu0 %v5299_v45, %s4631_s12 }
0x198c   :  { %v2603_v54 = vpop.permute.xlu1 %2602 }
0x198d   :  { %v2605_v55 = vmul.f32 %v4586_v31, %v2603_v54  ;;  %v3336_v54 = vld [vmem:[%s5612_s16 + $0x28] sm:$0xff] }
0x198f   :  { %2682 = vrot.lane.b32.xlu1 %v2605_v55, %s4631_s12  ;;  %v3335_v55 = vld [vmem:[%s5612_s16 + $0x20] sm:$0xff] }
0x19fc   :  { %v2608_v56 = vpop.permute.xlu0 %2607 }
0x19fd   :  { %4358 = vmatmul.mubr.msk.f32.vlgmr.msra.gmra.mxu0 %vm1064_vm2, %v2608_v56 }
0x19fe   :  { %4372 = vmatpush3.msra.mxu0 %v4619_v57  ;;  %4379 = vmatprep.mubr.msk.f32.mxu0 %vm4629_vm1, %v4628_v0 }
0x19ff   :  { %4373 = vmatprep.subr.mxu0 %v4628_v0 }
0x1a00   :  { %4374 = vmatpush3.msra.mxu0 %v4620_v59 }
0x1a01   :  { %4375 = vmatprep.subr.mxu0 %v4628_v0  ;;  %v2683_v60 = vpop.permute.xlu1 %2682 }
0x1a02   :  { %4376 = vmatpush3.msra.mxu0 %v4621_v61  ;;  %4369 = vmatmul.mubr.msk.f32.vlgmr.msra.gmra.mxu1 %vm1064_vm2, %v2683_v60 }
0x1a03   :  { %4377 = vmatprep.subr.mxu0 %v4628_v0  ;;  %4383 = vmatpush3.msra.mxu1 %v5002_v27  ;;  %v4624_v27 = vld [vmem:[%s5607_s11 + $0x60] sm:$0xff] }
0x1a04   :  { %4378 = vmatpush3.msra.mxu0 %v4622_v62  ;;  %4384 = vmatprep.subr.mxu1 %v4628_v0 }
0x1a05   :  { %4380 = vmatmul.mubr.msk.f32.vlgmr.msra.gmra.mxu0 %vm1064_vm2, %v2683_v60  ;;  %4393 = vmatprep.subr.mxu0 %v4628_v0 }
0x1a06   :  { %4394 = vmatpush3.msra.mxu0 %v4623_v1  ;;  %4401 = vmatprep.mubr.msk.f32.mxu0 %vm4629_vm1, %v4628_v0 }
0x1a07   :  { %4395 = vmatprep.subr.mxu0 %v4628_v0  ;;  %4385 = vmatpush3.msra.mxu1 %v5007_v28  ;;  %v4626_v28 = vld [vmem:[%s5607_s11 + $0x50] sm:$0xff] }
0x1a08   :  { %4396 = vmatpush3.msra.mxu0 %v4624_v27  ;;  %4386 = vmatprep.subr.mxu1 %v4628_v0 }
0x1a09   :  { %4397 = vmatprep.subr.mxu0 %v4628_v0  ;;  %4387 = vmatpush3.msra.mxu1 %v5014_v29 }
0x1a0a   :  { %4398 = vmatpush3.msra.mxu0 %v4625_v2  ;;  %4388 = vmatprep.subr.mxu1 %v4628_v0 }
0x1a0b   :  { %4399 = vmatprep.subr.mxu0 %v4628_v0  ;;  %4389 = vmatpush3.msra.mxu1 %v5021_v30 }
0x1a0c   :  { %4400 = vmatpush3.msra.mxu0 %v4626_v28  ;;  %4390 = vmatprep.mubr.msk.f32.mxu1 %vm4629_vm1, %v4628_v0 }
0x1a0d   :  { %4404 = vmatprep.subr.mxu0 %v4628_v0 }
0x1abd   :  { %v2677_v29 = vpop.f32.mrf.mxu0 }
0x1abf   :  { %v4359_v4 = vpop.f32.mrf.mxu0 }
0x1ac2   :  { %v2752_v63 = vpop.f32.mrf.mxu1 }
0x1ac3   :  { %v2753_v5 = vadd.f32 %v2752_v63, %v2677_v29  ;;  %v3566_v63 = vld [vmem:[%s5613_s18 + $0x10] sm:$0xff] }
0x1ac4   :  { %v4370_v3 = vpop.f32.mrf.mxu1 }
0x1ac5   :  { %v2847_v9 = vpop.f32.mrf.mxu0  ;;  %v3564_v3 = vld [vmem:[%s5613_s18] sm:$0xff] }
0x1ac6   :  { %v2851_v46 = vadd.f32 %v2847_v9, %v4900_v35  ;;  %v5359_v35 = vld [vmem:[%s5611_s13] ss:$0 sm:$0xff] }
0x1ac7   :  { %v4381_v47 = vpop.f32.mrf.mxu0  ;;  %v2756_v52 = vadd.f32 %v5359_v35, %v2753_v5  ;;  %v3565_v5 = vld [vmem:[%s5613_s18 + $0x8] sm:$0xff] }
0x1ac8   :  { %4591 = vtanh.f32 %v2851_v46  ;;  %v3879_v49 = vmul.f32 -1.442695, %v2851_v46 }
0x1ac9   :  { %v3877_v17 = vmul.f32 -1.442695, %v2756_v52 }
0x1aca   :  { %4593 = vpow2.f32 %v3879_v49 }
0x1ad5   :  { %v4592_v30 = vpop.eup %4591 }
0x1ad6   :  { %2861 = vrot.lane.b32.xlu0 %v4592_v30, %s4630_s28  ;;  %v3891_v30 = vld [vmem:[%s5614_s17] ss:$0 sm:$0xff] }
0x1ad7   :  { %v4594_v51 = vpop.eup %4593 }
0x1ad8   :  { %v2855_v53 = vadd.f32 1.0, %v4594_v51 }
0x1ada   :  { %4595 = vrcp.f32 %v2855_v53 }
0x1ae7   :  { %v4596_v48 = vpop.eup %4595 }
0x1ae8   :  { %v2859_v12 = vmul.f32 %v4596_v48, %v5294_v41  ;;  %v3185_v41 = vld [vmem:[%s5612_s16 + $0x8] sm:$0xff] }
0x1b48   :  { %v2862_v10 = vpop.permute.xlu0 %2861 }
0x1b49   :  { %v2864_v8 = vmul.f32 %v4596_v48, %v2862_v10 }
0x1b4b   :  { %2866 = vrot.lane.b32.xlu1 %v2864_v8, %s4631_s12 }
0x1bbd   :  { %v2867_v50 = vpop.permute.xlu1 %2866 }
0x1bbe   :  { %v2869_v11 = vadd.f32 %v2867_v50, %v2859_v12 }
0x1bc0   :  { %4597 = vtanh.f32 %v2869_v11 }
0x1bc1   :  { %4599 = vtanh.f32 %v2756_v52  ;;  %v27_v52 = vstv %s5615_s19 }
0x1bc2   :  { %4601 = vpow2.f32 %v3877_v17  ;;  %28 = vst [vmem:[#allocation2] sm:$0x1] %v27_v52 }
0x1bcd   :  { %v4598_v15 = vpop.eup %4597 }
0x1bce   :  { %2872 = vrot.lane.b32.xlu0 %v4598_v15, %s4630_s28  ;;  %v4600_v16 = vpop.eup %4599 }
0x1bcf   :  { %v4602_v18 = vpop.eup %4601 }
0x1bd0   :  { %v2760_v58 = vadd.f32 1.0, %v4602_v18 }
0x1bd2   :  { %2766 = vrot.lane.b32.xlu0 %v4600_v16, %s4630_s28  ;;  %4603 = vrcp.f32 %v2760_v58 }
0x1bdf   :  { %v4604_v25 = vpop.eup %4603 }
0x1be0   :  { %v2764_v40 = vmul.f32 %v4604_v25, %v5290_v37  ;;  %v3183_v37 = vld [vmem:[%s5609_s0] sm:$0x3] }
0x1c40   :  { %v2873_v21 = vpop.permute.xlu0 %2872 }
0x1c41   :  { %v2875_v23 = vmul.f32 %v4596_v48, %v2873_v21 }
0x1c43   :  { %2952 = vrot.lane.b32.xlu1 %v2875_v23, %s4631_s12 }
0x1c44   :  { %v2767_v31 = vpop.permute.xlu0 %2766 }
0x1c45   :  { %v2769_v32 = vmul.f32 %v4604_v25, %v2767_v31 }
0x1c47   :  { %2771 = vrot.lane.b32.xlu1 %v2769_v32, %s4631_s12 }
0x1cb5   :  { %v2953_v34 = vpop.permute.xlu1 %2952 }
0x1cb6   :  { %4402 = vmatmul.mubr.msk.f32.vlgmr.msra.gmra.mxu0 %vm1064_vm2, %v2953_v34  ;;  %v3104_v34 = vld [vmem:[%s5616_s14 + $0xf8] sm:$0xff] }
0x1cb7   :  { %4405 = vmatpush3.msra.mxu0 %v3188_v33  ;;  %4408 = vmatprep.mubr.msk.f32.mxu0 %vm4629_vm1, %v4628_v0 }
0x1cb8   :  { %4406 = vmatprep.subr.mxu0 %v4628_v0  ;;  %4036 = vmatprep.subr.mxu1 %v3104_v34 }
0x1cb9   :  { %4407 = vmatpush3.msra.mxu0 %v3187_v36  ;;  %v2772_v42 = vpop.permute.xlu1 %2771  ;;  %v3088_v36 = vld [vmem:[%s5616_s14 + $0x78] sm:$0xff] }
0x1cba   :  { %v5383_v43 = vadd.f32 %v2772_v42, %v2764_v40  ;;  %4409 = vmatmul.mubr.msk.f32.vlgmr.msra.gmra.mxu0 %vm79_vm0, %v3186_v39  ;;  %4411 = vmatprep.subr.mxu0 %v4628_v0  ;;  %v3103_v39 = vld [vmem:[%s5616_s14 + $0xf0] sm:$0xff]  ;;  %v3086_v42 = vld [vmem:[%s5616_s14 + $0x68] sm:$0xff] }
0x1cbb   :  { %4412 = vmatpush3.msra.mxu0 %v3185_v41  ;;  %4415 = vmatprep.mubr.msk.f32.mxu0 %vm4629_vm1, %v4628_v0  ;;  %v3087_v40 = vld [vmem:[%s5616_s14 + $0x70] sm:$0xff]  ;;  %v3102_v41 = vld [vmem:[%s5616_s14 + $0xe8] sm:$0xff] }
0x1cbc   :  { %4605 = vtanh.f32 %v5383_v43  ;;  %4413 = vmatprep.subr.mxu0 %v4628_v0 }
0x1cbd   :  { %4414 = vmatpush3.msra.mxu0 %v3184_v44  ;;  %v3101_v44 = vld [vmem:[%s5616_s14 + $0xe0] sm:$0xff] }
0x1cbe   :  { %4416 = vmatmul.mubr.msk.f32.vlgmr.msra.gmra.mxu0 %vm79_vm0, %v3183_v37  ;;  %4418 = vmatprep.subr.mxu0 %v4628_v0  ;;  %v3085_v37 = vld [vmem:[%s5616_s14 + $0x60] sm:$0xff] }
0x1cbf   :  { %4419 = vmatpush3.msra.mxu0 %v3336_v54  ;;  %4422 = vmatprep.mubr.msk.f32.mxu0 %vm4629_vm1, %v4628_v0  ;;  %v3100_v54 = vld [vmem:[%s5616_s14 + $0xd8] sm:$0xff] }
0x1cc0   :  { %4420 = vmatprep.subr.mxu0 %v4628_v0 }
0x1cc1   :  { %4421 = vmatpush3.msra.mxu0 %v3335_v55  ;;  %v3084_v55 = vld [vmem:[%s5616_s14 + $0x58] sm:$0xff] }
0x1cc2   :  { %4423 = vmatmul.mubr.msk.f32.vlgmr.msra.gmra.mxu0 %vm79_vm0, %v4862_v13  ;;  %4425 = vmatprep.subr.mxu0 %v4628_v0 }
0x1cc3   :  { %4427 = vmatprep.mubr.msk.f32.mxu0 %vm4629_vm1, %v4628_v0 }
0x1cc9   :  { %v4606_v56 = vpop.eup %4605 }
0x1cca   :  { %2777 = vrot.lane.b32.xlu0 %v4606_v56, %s4630_s28  ;;  %v3099_v56 = vld [vmem:[%s5616_s14 + $0xd0] sm:$0xff] }
0x1d3c   :  { %v2778_v57 = vpop.permute.xlu0 %2777 }
0x1d3d   :  { %v5414_v59 = vmul.f32 %v4604_v25, %v2778_v57  ;;  %v3083_v57 = vld [vmem:[%s5616_s14 + $0x50] sm:$0xff] }
0x1d3f   :  { %2877 = vrot.lane.b32.xlu1 %v5414_v59, %s4631_s12 }
0x1d76   :  { %v3022_v60 = vpop.f32.mrf.mxu0 }
0x1d78   :  { %v4403_v61 = vpop.f32.mrf.mxu0 }
0x1d79   :  { %v3082_v61 = vld [vmem:[%s5616_s14 + $0x48] sm:$0xff] }
0x1d7a   :  { %v3258_v62 = vpop.f32.mrf.mxu0 }
0x1d7c   :  { %v4410_v1 = vpop.f32.mrf.mxu0 }
0x1d7d   :  { %v3081_v1 = vld [vmem:[%s5616_s14 + $0x40] sm:$0xff] }
0x1d7e   :  { %v3331_v27 = vpop.f32.mrf.mxu0 }
0x1d7f   :  { %v3332_v28 = vadd.f32 %v3331_v27, %v3258_v62  ;;  %v3097_v62 = vld [vmem:[%s5616_s14 + $0xc0] sm:$0xff]  ;;  %v3096_v27 = vld [vmem:[%s5616_s14 + $0xb8] sm:$0xff] }
0x1d80   :  { %v4417_v13 = vpop.f32.mrf.mxu0 }
0x1d82   :  { %v3403_v2 = vpop.f32.mrf.mxu0 }
0x1d83   :  { %4426 = vmatpush3.msk.msra.mxu0 %vm404_vm3, %v3403_v2  ;;  %v3080_v2 = vld [vmem:[%s5616_s14 + $0x38] sm:$0xff] }
0x1d84   :  { %v4424_v29 = vpop.f32.mrf.mxu0  ;;  %4428 = vmatmul.mubr.msk.f32.vlgmr.msra.gmra.mxu0 %vm400_vm4, %v4889_v26  ;;  %4430 = vmatprep.subr.mxu0 %v4628_v0  ;;  %v3567_v26 = vld [vmem:[%s5613_s18 + $0x18] sm:$0xff]  ;;  %vm3648_vm4 = vcmask 7168  }
0x1d85   :  { %4431 = vmatpush3.msk.msra.mxu0 %vm949_vm8, %v3332_v28  ;;  %4432 = vmatprep.mubr.msk.f32.mxu0 %vm4629_vm1, %v4628_v0  ;;  %v3095_v29 = vld [vmem:[%s5616_s14 + $0xb0] sm:$0xff] }
0x1d86   :  { %4435 = vmatprep.subr.mxu0 %v4628_v0 }
0x1d88   :  { %4433 = vmatmul.mubr.msk.f32.vlgmr.msra.gmra.mxu0 %vm945_vm12, %v4878_v24 }
0x1d89   :  { %4443 = vmatprep.mubr.msk.f32.mxu0 %vm4629_vm1, %v4628_v0  ;;  %4436 = vmatpush3.msra.mxu0 %v3567_v26  ;;  %v3094_v26 = vld [vmem:[%s5616_s14 + $0xa8] sm:$0xff] }
0x1d8a   :  { %4437 = vmatprep.subr.mxu0 %v4628_v0 }
0x1d8b   :  { %4438 = vmatpush3.msra.mxu0 %v3566_v63  ;;  %v3078_v63 = vld [vmem:[%s5616_s14 + $0x28] sm:$0xff] }
0x1d8c   :  { %4439 = vmatprep.subr.mxu0 %v4628_v0 }
0x1d8d   :  { %4440 = vmatpush3.msra.mxu0 %v3565_v5  ;;  %v3093_v5 = vld [vmem:[%s5616_s14 + $0xa0] sm:$0xff] }
0x1d8e   :  { %4441 = vmatprep.subr.mxu0 %v4628_v0 }
0x1d8f   :  { %4442 = vmatpush3.msra.mxu0 %v3564_v3  ;;  %v3077_v3 = vld [vmem:[%s5616_s14 + $0x20] sm:$0xff] }
0x1d90   :  { %4446 = vmatprep.subr.mxu0 %v4628_v0 }
0x1db1   :  { %v2878_v4 = vpop.permute.xlu1 %2877 }
0x1db2   :  { %4391 = vmatmul.mubr.msk.f32.vlgmr.msra.gmra.mxu1 %vm1064_vm2, %v2878_v4 }
0x1db3   :  { %4037 = vmatpush3.msra.mxu1 %v3088_v36 }
0x1db4   :  { %4038 = vmatprep.subr.mxu1 %v3103_v39 }
0x1db5   :  { %4039 = vmatpush3.msra.mxu1 %v3087_v40 }
0x1db6   :  { %4040 = vmatprep.subr.mxu1 %v3102_v41 }
0x1db7   :  { %4041 = vmatpush3.msra.mxu1 %v3086_v42 }
0x1db8   :  { %4042 = vmatprep.subr.mxu1 %v3101_v44 }
0x1db9   :  { %4043 = vmatpush3.msra.mxu1 %v3085_v37 }
0x1dba   :  { %4044 = vmatprep.subr.mxu1 %v3100_v54 }
0x1dbb   :  { %4045 = vmatpush3.msra.mxu1 %v3084_v55 }
0x1dbc   :  { %4046 = vmatprep.subr.mxu1 %v3099_v56 }
0x1dbd   :  { %4047 = vmatpush3.msra.mxu1 %v3083_v57 }
0x1e44   :  { %v3476_v9 = vpop.f32.mrf.mxu0 }
0x1e46   :  { %v4429_v46 = vpop.f32.mrf.mxu0 }
0x1e47   :  { %v3076_v46 = vld [vmem:[%s5616_s14 + $0x18] sm:$0xff] }
0x1e48   :  { %v3549_v47 = vpop.f32.mrf.mxu0 }
0x1e49   :  { %v3550_v49 = vadd.f32 %v3549_v47, %v3476_v9  ;;  %v3092_v9 = vld [vmem:[%s5616_s14 + $0x98] sm:$0xff]  ;;  %v3091_v47 = vld [vmem:[%s5616_s14 + $0x90] sm:$0xff] }
0x1e4a   :  { %v4434_v51 = vpop.f32.mrf.mxu0 }
0x1e4b   :  { %v3560_v53 = vadd.f32 %v3891_v30, %v3550_v49  ;;  %v3075_v30 = vld [vmem:[%s5616_s14 + $0x10] sm:$0xff]  ;;  %v3090_v49 = vld [vmem:[%s5616_s14 + $0x88] sm:$0xff] }
0x1e4c   :  { %v3074_v51 = vld [vmem:[%s5616_s14 + $0x8] sm:$0xff] }
0x1e4d   :  { %vm3561_vm3 = vcmp.gt.f32.partialorder %v3560_v53, 0.0  ;;  %v3562_v48 = vmul.f32 0.01, %v3560_v53 }
0x1e4f   :  { %v3563_v10 = vsel %vm3561_vm3, %v3560_v53, %v3562_v48  ;;  %v3089_v53 = vld [vmem:[%s5616_s14 + $0x80] sm:$0xff] }
0x1e50   :  { %4444 = vmatmul.mubr.msk.f32.vlgmr.msra.gmra.mxu0 %vm1064_vm2, %v3563_v10  ;;  %v3073_v48 = vld [vmem:[%s5616_s14] sm:$0xff] }
0x1e51   :  { %4448 = vmatprep.mubr.msk.f32.mxu0 %vm4629_vm1, %v4628_v0 }
0x1e72   :  { %v2947_v8 = vpop.f32.mrf.mxu1 }
0x1e73   :  { %v3023_v12 = vadd.f32 %v3022_v60, %v2947_v8  ;;  %v3098_v60 = vld [vmem:[%s5616_s14 + $0xc8] sm:$0xff]  ;;  %v4469_v8 = vpack.i.bf16 %v5083_v19, %v5299_v45  ;;  %v616_v45 = vmul.u32 4, %v4873_v22 }
0x1e74   :  { %v4392_v50 = vpop.f32.mrf.mxu1  ;;  %4048 = vmatprep.subr.mxu1 %v3098_v60 }
0x1e75   :  { %v3026_v11 = vadd.f32 %v5359_v35, %v3023_v12  ;;  %v3892_v35 = vld [vmem:[#allocation2] ss:$0 sm:$0xff]  ;;  %4049 = vmatpush3.msra.mxu1 %v3082_v61  ;;  %v4474_v12 = vpack.i.bf16 %v5137_v14, %v5414_v59  ;;  %vm617_vm5 = vcmp.ge.s32.totalorder %v4868_v20, %v616_v45 }
0x1e76   :  { %4050 = vmatprep.subr.mxu1 %v3097_v62 }
0x1e77   :  { %4607 = vtanh.f32 %v3026_v11  ;;  %v3882_v16 = vmul.f32 -1.442695, %v3026_v11  ;;  %4051 = vmatpush3.msra.mxu1 %v3081_v1 }
0x1e78   :  { %4052 = vmatprep.subr.mxu1 %v3096_v27 }
0x1e79   :  { %4609 = vpow2.f32 %v3882_v16  ;;  %4053 = vmatpush3.msra.mxu1 %v3080_v2 }
0x1e7a   :  { %4054 = vmatprep.subr.mxu1 %v3095_v29 }
0x1e84   :  { %v4608_v15 = vpop.eup %4607 }
0x1e85   :  { %3036 = vrot.lane.b32.xlu1 %v4608_v15, %s4630_s28 }
0x1e86   :  { %v4610_v17 = vpop.eup %4609 }
0x1e87   :  { %v3030_v18 = vadd.f32 1.0, %v4610_v17 }
0x1e89   :  { %4611 = vrcp.f32 %v3030_v18 }
0x1e96   :  { %v5458_v58 = vpop.eup %4611 }
0x1e97   :  { %v3034_v13 = vmul.f32 %v5458_v58, %v5383_v43  ;;  %v3079_v43 = vld [vmem:[%s5616_s14 + $0x30] sm:$0xff] }
0x1e98   :  { %4055 = vmatpush3.msra.mxu1 %v3079_v43 }
0x1e99   :  { %4056 = vmatprep.subr.mxu1 %v3094_v26 }
0x1e9a   :  { %4057 = vmatpush3.msra.mxu1 %v3078_v63 }
0x1e9b   :  { %4058 = vmatprep.subr.mxu1 %v3093_v5 }
0x1e9c   :  { %4059 = vmatpush3.msra.mxu1 %v3077_v3 }
0x1e9d   :  { %4060 = vmatprep.subr.mxu1 %v3092_v9 }
0x1e9e   :  { %4061 = vmatpush3.msra.mxu1 %v3076_v46 }
0x1e9f   :  { %4062 = vmatprep.subr.mxu1 %v3091_v47 }
0x1ea0   :  { %4063 = vmatpush3.msra.mxu1 %v3075_v30 }
0x1ea1   :  { %4064 = vmatprep.subr.mxu1 %v3090_v49 }
0x1ea2   :  { %4065 = vmatpush3.msra.mxu1 %v3074_v51 }
0x1ea3   :  { %4066 = vmatprep.subr.mxu1 %v3089_v53 }
0x1ea4   :  { %4067 = vmatpush3.msra.mxu1 %v3073_v48 }
0x1ea5   :  { %4451 = vmatprep.subr.mxu1 %v4628_v0 }
0x1ef7   :  { %v3037_v21 = vpop.permute.xlu1 %3036 }
0x1ef8   :  { %v3039_v23 = vmul.f32 %v5458_v58, %v3037_v21 }
0x1efa   :  { %3041 = vrot.lane.b32.xlu1 %v3039_v23, %s4631_s12 }
0x1f10   :  { %v3644_v25 = vpop.f32.mrf.mxu0 }
0x1f11   :  { %v5462_v31 = vadd.f32 %v3892_v35, %v3644_v25  ;;  %v618_v35 = vadd.s32 4, %v616_v45 }
0x1f12   :  { %v4445_v32 = vpop.f32.mrf.mxu0 }
0x1f13   :  { %v3649_v33 = vsel %vm3648_vm4, %v5462_v31, -inf  ;;  %vm619_vm6 = vcmp.lt.s32.totalorder %v4868_v20, %v618_v35 }
0x1f14   :  { %3650 = vmax.xlane.f32.xlu0 %v3649_v33  ;;  %vm620_vm7 = vmand %vm617_vm5, %vm619_vm6 }
0x1f15   :  { %v3834_v14 = vsel %vm620_vm7, 1.0, %v4628_v0 }
0x1f6c   :  { %v3042_v28 = vpop.permute.xlu1 %3041 }
0x1f6d   :  { %v3044_v4 = vadd.f32 %v3042_v28, %v3034_v13 }
0x1f6f   :  { %4613 = vtanh.f32 %v3044_v4 }
0x1f7c   :  { %v4614_v10 = vpop.eup %4613 }
0x1f7d   :  { %3047 = vrot.lane.b32.xlu1 %v4614_v10, %s4630_s28 }
0x1f81   :  { %4470 = vrot.lane.b32.xlu1 %v4469_v8, %s4630_s28 }
0x1f85   :  { %4475 = vrot.lane.b32.xlu1 %v4474_v12, %s4632_s5 }
0x1f9d   :  { %v3651_v50 = vpop.xlane.xlu0 %3650 }
0x1f9e   :  { %v3652_v11 = vrot.slane %v3651_v50, 4 }
0x1fa0   :  { %v3653_v52 = vmax.f32 %v3651_v50, %v3652_v11 }
0x1fa2   :  { %v3654_v15 = vrot.slane %v3653_v52, 2 }
0x1fa4   :  { %v3655_v16 = vmax.f32 %v3653_v52, %v3654_v15 }
0x1fa6   :  { %v3656_v17 = vrot.slane %v3655_v16, 1 }
0x1fa8   :  { %v3657_v18 = vmax.f32 %v3655_v16, %v3656_v17 }
0x1faa   :  { %4462 = vpush %v3657_v18 }
0x1fdb   :  { %s4463_s14 = spop %4462 }
0x1fdc   :  { %v3659_v21 = vstv %s4463_s14 }
0x1fdd   :  { %v3660_v23 = vsub.f32 %v5462_v31, %v3659_v21 }
0x1fdf   :  { %v3661_v19 = vmul.f32 1.442695, %v3660_v23 }
0x1fe1   :  { %4615 = vpow2.f32 %v3661_v19 }
0x1fee   :  { %v4616_v59 = vpop.eup %4615 }
0x1fef   :  { %4447 = vmatpush3.msra.mxu0 %v4616_v59  ;;  %v3048_v25 = vpop.permute.xlu1 %3047 }
0x1ff0   :  { %4449 = vmatmul.mubr.msk.f32.vlgmr.msra.gmra.mxu0 %vm3663_vm9, %v3834_v14  ;;  %v3050_v39 = vmul.f32 %v5458_v58, %v3048_v25 }
0x1ff3   :  { %v4471_v32 = vpop.permute.xlu1 %4470 }
0x1ff4   :  { %v4473_v33 = vunpack.i.h.bf16 %v4471_v32  ;;  %v4472_v31 = vunpack.i.l.bf16 %v4471_v32 }
0x1ff6   :  { %v3065_v20 = vsel %vm1064_vm2, %v5031_v38, %v4473_v33  ;;  %v3070_v40 = vsel %vm1064_vm2, %v5247_v6, %v4472_v31  ;;  %v3883_v6 = vld [vmem:[%s5617_s15] ss:$0 sm:$0xff] }
0x1ff7   :  { %v4476_v34 = vpop.permute.xlu1 %4475 }
0x1ff8   :  { %v4478_v22 = vunpack.i.h.bf16 %v4476_v34  ;;  %v4477_v36 = vunpack.i.l.bf16 %v4476_v34 }
0x1ffa   :  { %v3067_v41 = vsel %vm3066_vm10, %v3065_v20, %v4478_v22  ;;  %v3071_v42 = vsel %vm3066_vm10, %v3070_v40, %v4477_v36 }
0x1ffb   :  { %v3072_v44 = vsel %vm3068_vm11, %v3071_v42, %v3050_v39  ;;  %v3069_v37 = vsel %vm3068_vm11, %v3067_v41, %v5191_v7 }
0x1ffc   :  { %3176 = vmatprep.mubr.f32.mxu1 %v3072_v44 }
0x1ffd   :  { %3177 = vmatmul.mubr.f32.vlgmr.msra.gmra.mxu1 %v3069_v37 }
0x1ffe   :  { %4453 = vmatprep.mubr.msk.f32.mxu1 %vm4629_vm1, %v4628_v0 }
0x20b0   :  { %v3733_v54 = vpop.f32.mrf.mxu0 }
0x20b1   :  { %4452 = vmatpush3.msk.msra.mxu1 %vm949_vm8, %v3733_v54 }
0x20b2   :  { %v4450_v58 = vpop.f32.mrf.mxu0  ;;  %4454 = vmatmul.mubr.msk.f32.vlgmr.msra.gmra.mxu1 %vm945_vm12, %v4878_v24 }
0x20bd   :  { %v4068_v38 = vpop.f32.mrf.mxu1 }
0x20bf   :  { %v4069_v55 = vpop.f32.mrf.mxu1 }
0x20c0   :  { %v4070_v56 = vadd.f32 %v4069_v55, %v4068_v38 }
0x20c2   :  { %v3179_v7 = vadd.f32 %v4070_v56, %v3883_v6 }
0x20c4   :  { %3182 = vst.msk [vmem:[%s5618_s20] sm:$0xff] %vm79_vm0, %v3179_v7 }
0x2172   :  { %v3806_v0 = vpop.f32.mrf.mxu1 }
0x2173   :  { %4617 = vrcp.f32 %v3806_v0 }
0x2174   :  { %v4455_v57 = vpop.f32.mrf.mxu1 }
0x2180   :  { %v4618_v60 = vpop.eup %4617 }
0x2181   :  { %v3811_v61 = vmul.f32 %v4618_v60, %v4616_v59 }
0x2183   :  { %3812 = vst.msk [vmem:[%s5619_s21] sm:$0xff] %vm3648_vm4, %v3811_v61 }

</bundles_post_ra>
